<compile_context>
chip_gen: v5e
topology: v5e:2x2
jax: 0.10.0
libtpu: 0.0.40
codegen_flags: <defaults>
</compile_context>

<pallas_src>
import jax
import jax.numpy as jnp
from jax.experimental import pallas as pl
from jax.experimental.pallas import tpu as pltpu

raw_text = (
    'We are about to study the idea of a computational process.\n'
    'Computational processes are abstract beings that inhabit computers.\n'
    'As they evolve, processes manipulate other abstract things called data.\n'
    'The evolution of a process is directed by a pattern of rules\n'
    'called a program. People create programs to direct processes. In effect,\n'
    'we conjure the spirits of the computer with our spells.'
).split()

vocab = sorted(set(raw_text))
VOCAB_SIZE = len(vocab)                        # 49
EMBEDDING_DIM = 10
CONTEXT_SIZE = 2
HIDDEN = 128
N_CTX = 2 * CONTEXT_SIZE                       # 4 context words per example
D_IN = N_CTX * EMBEDDING_DIM                   # 40 (logical linear1 fan-in)

# Padded / slotted layout constants (all picked once, at init time).
V_SLOT = 64                                    # per-context one-hot slot (>= V, pow2)
E_PAD = 16                                     # per-context embedding slot (8-aligned)
OH_WIDTH = N_CTX * V_SLOT                      # 256  (one-hot lane width, 128-dense)
D_IN_PAD = N_CTX * E_PAD                       # 64   (padded linear1 fan-in)
VOCAB_PAD = ((VOCAB_SIZE + 127) // 128) * 128  # 128  (lane-dense logits/output)
NEG_BIG = -1e30                                # padded logit lanes -> ~0 in softmax

B_TILE = 128   # batch rows per grid step (fills MXU rows; use 256 on v6e/v7x)

assert V_SLOT >= VOCAB_SIZE and (V_SLOT & (V_SLOT - 1)) == 0
assert E_PAD >= EMBEDDING_DIM and E_PAD % 8 == 0
assert B_TILE % 8 == 0


def cbow_kernel(idx_ref, emb_bd_ref, w1_ref, b1_ref, w2_ref, b2_ref, out_ref):
    # idx_ref    : VMEM (B_TILE, N_CTX) int32   context word indices
    # emb_bd_ref : VMEM (OH_WIDTH, D_IN_PAD)    block-diagonal embedding table
    # w1_ref     : VMEM (D_IN_PAD, HIDDEN)      slot-padded linear1 (in, out)
    # b1_ref     : VMEM (1, HIDDEN)
    # w2_ref     : VMEM (HIDDEN, VOCAB_PAD)     zero-padded columns
    # b2_ref     : VMEM (1, VOCAB_PAD)          padded lanes = NEG_BIG
    # out_ref    : VMEM (B_TILE, VOCAB_PAD)     log-probabilities (padded)
    idx = idx_ref[...]                                              # (B, 2C) int32

    # One-hot over stacked per-context slots: oh[b, c*V_SLOT + v] = (idx[b,c]==v).
    # Built with a lane iota + N_CTX broadcast compares (pure VPU work).
    lane = jax.lax.broadcasted_iota(jnp.int32, (B_TILE, OH_WIDTH), 1)
    oh = jnp.zeros((B_TILE, OH_WIDTH), jnp.float32)
    for c in range(N_CTX):                                          # static unroll
        # idx < VOCAB_SIZE <= V_SLOT, so this compare only hits slot c's lanes.
        oh = oh + (lane == (idx[:, c:c + 1] + c * V_SLOT)).astype(jnp.float32)

    # MXU push 1: fused gather + "flatten" -> (B, D_IN_PAD) activation.
    x = jnp.dot(oh, emb_bd_ref[...], preferred_element_type=jnp.float32)

    # MXU push 2: linear1 + relu.
    h = jnp.dot(x, w1_ref[...], preferred_element_type=jnp.float32) + b1_ref[...]
    h = jnp.maximum(h, 0.0)

    # MXU push 3: linear2 (lane-dense padded vocab).
    logits = jnp.dot(h, w2_ref[...], preferred_element_type=jnp.float32) + b2_ref[...]

    # log_softmax over the padded vocab axis; padded lanes sit at -1e30 so they
    # cannot win the max nor contribute to the exp-sum.
    m = jnp.max(logits, axis=-1, keepdims=True)
    shifted = logits - m
    lse = jnp.log(jnp.sum(jnp.exp(shifted), axis=-1, keepdims=True))
    out_ref[...] = shifted - lse


def cbow_forward(idx, emb_bd, w1_pad, b1, w2_pad, b2_pad):
    """idx: (B, 2*CONTEXT_SIZE) int32 word indices (one CBOW window per row).

    Returns (B, VOCAB_PAD) log-probabilities; only the first VOCAB_SIZE lanes
    are meaningful (slice at the consumer to stay lane-dense here).
    """
    B = idx.shape[0]
    Bp = ((B + B_TILE - 1) // B_TILE) * B_TILE
    if Bp != B:                                    # static (shape-level) padding
        idx = jnp.pad(idx, ((0, Bp - B), (0, 0)))

    grid_spec = pltpu.PrefetchScalarGridSpec(
        num_scalar_prefetch=0,
        grid=(Bp // B_TILE,),
        in_specs=[
            pl.BlockSpec((B_TILE, N_CTX), lambda i: (i, 0)),
            pl.BlockSpec((OH_WIDTH, D_IN_PAD), lambda i: (0, 0)),
            pl.BlockSpec((D_IN_PAD, HIDDEN), lambda i: (0, 0)),
            pl.BlockSpec((1, HIDDEN), lambda i: (0, 0)),
            pl.BlockSpec((HIDDEN, VOCAB_PAD), lambda i: (0, 0)),
            pl.BlockSpec((1, VOCAB_PAD), lambda i: (0, 0)),
        ],
        out_specs=pl.BlockSpec((B_TILE, VOCAB_PAD), lambda i: (i, 0)),
    )
    out = pl.pallas_call(
        cbow_kernel,
        out_shape=jax.ShapeDtypeStruct((Bp, VOCAB_PAD), jnp.float32),
        grid_spec=grid_spec,
        compiler_params=pltpu.CompilerParams(dimension_semantics=("parallel",)),
    )(idx.astype(jnp.int32), emb_bd, w1_pad, b1, w2_pad, b2_pad)
    return out[:B] if Bp != B else out


cbow_forward_jit = jax.jit(cbow_forward)


def init_params(key):
    """Logical module parameters (same shapes/init style as the PyTorch module)."""
    k_emb, k_w1, k_b1, k_w2, k_b2 = jax.random.split(key, 5)
    emb = jax.random.normal(k_emb, (VOCAB_SIZE, EMBEDDING_DIM), jnp.float32)
    bound1 = 1.0 / jnp.sqrt(D_IN)
    w1 = jax.random.uniform(k_w1, (D_IN, HIDDEN), jnp.float32, -bound1, bound1)
    b1 = jax.random.uniform(k_b1, (1, HIDDEN), jnp.float32, -bound1, bound1)
    bound2 = 1.0 / jnp.sqrt(HIDDEN)
    w2 = jax.random.uniform(k_w2, (HIDDEN, VOCAB_SIZE), jnp.float32, -bound2, bound2)
    b2 = jax.random.uniform(k_b2, (1, VOCAB_SIZE), jnp.float32, -bound2, bound2)
    return emb, w1, b1, w2, b2


def pack_params(emb, w1, b1, w2, b2):
    """One-time layout plumbing (no math changed, done once outside the kernel).

    * emb -> block-diagonal (OH_WIDTH, D_IN_PAD): emb_bd[c*64+v, c*16+e] = emb[v,e]
      so a single one-hot matmul performs gather + concat for all 2C contexts.
    * w1  -> slot-padded (D_IN_PAD, HIDDEN): rows c*16+e (e<E) hold w1 rows, the
      padding rows are zero, so slices are sublane-aligned and never touched
      inside the kernel.
    * w2/b2 -> lane-dense VOCAB_PAD with zero weight cols / -1e30 bias lanes.
    """
    emb_bd = jnp.zeros((OH_WIDTH, D_IN_PAD), jnp.float32)
    w1_pad = jnp.zeros((D_IN_PAD, HIDDEN), jnp.float32)
    for c in range(N_CTX):
        emb_bd = emb_bd.at[
            c * V_SLOT:c * V_SLOT + VOCAB_SIZE,
            c * E_PAD:c * E_PAD + EMBEDDING_DIM].set(emb)
        w1_pad = w1_pad.at[c * E_PAD:c * E_PAD + EMBEDDING_DIM, :].set(
            w1[c * EMBEDDING_DIM:(c + 1) * EMBEDDING_DIM, :])
    w2_pad = jnp.zeros((HIDDEN, VOCAB_PAD), jnp.float32).at[:, :VOCAB_SIZE].set(w2)
    b2_pad = jnp.full((1, VOCAB_PAD), NEG_BIG, jnp.float32).at[:, :VOCAB_SIZE].set(b2)
    return emb_bd, w1_pad, b1, w2_pad, b2_pad


if __name__ == "__main__":
    key = jax.random.PRNGKey(0)
    emb, w1, b1, w2, b2 = init_params(key)
    emb_bd, w1_pad, b1, w2_pad, b2_pad = pack_params(emb, w1, b1, w2, b2)

    # A batch of B context windows (each row = one module forward call).
    B = 256
    idx = jax.random.randint(
        jax.random.PRNGKey(1), (B, N_CTX), 0, VOCAB_SIZE, dtype=jnp.int32)

    out_pad = cbow_forward_jit(idx, emb_bd, w1_pad, b1, w2_pad, b2_pad)
    out_pad = jax.block_until_ready(out_pad)
    assert out_pad.shape == (B, VOCAB_PAD)

    # Consumer-side slice + sanity check against a pure-JAX reference
    # (unpadded math, identical per-row semantics to the PyTorch module).
    log_probs = out_pad[:, :VOCAB_SIZE]
    embeds = jnp.take(emb, idx.reshape(-1), axis=0).reshape(B, D_IN)
    ref = jnp.maximum(embeds @ w1 + b1, 0.0) @ w2 + b2
    ref = ref - jax.scipy.special.logsumexp(ref, axis=1, keepdims=True)
    assert jnp.allclose(log_probs, ref, atol=1e-4), "mismatch vs reference"

    print("KERNEL_OK")
</pallas_src>

<mosaic_0001>
module attributes {stable_mosaic.version = 11 : i64} {
  func.func @cbow_kernel(%arg0: i32, %arg1: memref<128x4xi32, #tpu.memory_space<vmem>>, %arg2: memref<256x64xf32, #tpu.memory_space<vmem>>, %arg3: memref<64x128xf32, #tpu.memory_space<vmem>>, %arg4: memref<1x128xf32, #tpu.memory_space<vmem>>, %arg5: memref<128x128xf32, #tpu.memory_space<vmem>>, %arg6: memref<1x128xf32, #tpu.memory_space<vmem>>, %arg7: memref<128x128xf32, #tpu.memory_space<vmem>>) attributes {dimension_semantics = [#tpu.dimension_semantics<parallel>], iteration_bounds = array<i64: 2>, scalar_prefetch = 0 : i64, scratch_operands = 0 : i64, tpu.core_type = #tpu.core_type<tc>, window_params = [{transform_indices = @transform_0, window_bounds = array<i64: 128, 4>}, {pipeline_mode = #tpu.pipeline_mode<synchronous>, transform_indices = @transform_1, window_bounds = array<i64: 256, 64>}, {pipeline_mode = #tpu.pipeline_mode<synchronous>, transform_indices = @transform_2, window_bounds = array<i64: 64, 128>}, {pipeline_mode = #tpu.pipeline_mode<synchronous>, transform_indices = @transform_3, window_bounds = array<i64: 1, 128>}, {pipeline_mode = #tpu.pipeline_mode<synchronous>, transform_indices = @transform_4, window_bounds = array<i64: 128, 128>}, {pipeline_mode = #tpu.pipeline_mode<synchronous>, transform_indices = @transform_5, window_bounds = array<i64: 1, 128>}, {transform_indices = @transform_6, window_bounds = array<i64: 128, 128>}]} {
    %c0 = arith.constant 0 : index
    %c0_0 = arith.constant 0 : index
    %0 = vector.load %arg1[%c0, %c0_0] : memref<128x4xi32, #tpu.memory_space<vmem>>, vector<128x4xi32>
    %1 = tpu.iota {dimensions = array<i32: 1>} : vector<128x256xi32>
    %cst = arith.constant 0.000000e+00 : f32
    %2 = vector.broadcast %cst : f32 to vector<128x256xf32>
    %3 = vector.extract_strided_slice %0 {offsets = [0, 0], sizes = [128, 1], strides = [1, 1]} : vector<128x4xi32> to vector<128x1xi32>
    %c0_i32 = arith.constant 0 : i32
    %4 = vector.broadcast %c0_i32 : i32 to vector<128x1xi32>
    %5 = arith.addi %3, %4 : vector<128x1xi32>
    %6 = vector.broadcast %5 : vector<128x1xi32> to vector<128x256xi32>
    %7 = arith.cmpi eq, %1, %6 : vector<128x256xi32>
    %8 = arith.extui %7 : vector<128x256xi1> to vector<128x256xi32>
    %9 = arith.sitofp %8 : vector<128x256xi32> to vector<128x256xf32>
    %10 = arith.addf %2, %9 : vector<128x256xf32>
    %11 = vector.extract_strided_slice %0 {offsets = [0, 1], sizes = [128, 1], strides = [1, 1]} : vector<128x4xi32> to vector<128x1xi32>
    %c64_i32 = arith.constant 64 : i32
    %12 = vector.broadcast %c64_i32 : i32 to vector<128x1xi32>
    %13 = arith.addi %11, %12 : vector<128x1xi32>
    %14 = vector.broadcast %13 : vector<128x1xi32> to vector<128x256xi32>
    %15 = arith.cmpi eq, %1, %14 : vector<128x256xi32>
    %16 = arith.extui %15 : vector<128x256xi1> to vector<128x256xi32>
    %17 = arith.sitofp %16 : vector<128x256xi32> to vector<128x256xf32>
    %18 = arith.addf %10, %17 : vector<128x256xf32>
    %19 = vector.extract_strided_slice %0 {offsets = [0, 2], sizes = [128, 1], strides = [1, 1]} : vector<128x4xi32> to vector<128x1xi32>
    %c128_i32 = arith.constant 128 : i32
    %20 = vector.broadcast %c128_i32 : i32 to vector<128x1xi32>
    %21 = arith.addi %19, %20 : vector<128x1xi32>
    %22 = vector.broadcast %21 : vector<128x1xi32> to vector<128x256xi32>
    %23 = arith.cmpi eq, %1, %22 : vector<128x256xi32>
    %24 = arith.extui %23 : vector<128x256xi1> to vector<128x256xi32>
    %25 = arith.sitofp %24 : vector<128x256xi32> to vector<128x256xf32>
    %26 = arith.addf %18, %25 : vector<128x256xf32>
    %27 = vector.extract_strided_slice %0 {offsets = [0, 3], sizes = [128, 1], strides = [1, 1]} : vector<128x4xi32> to vector<128x1xi32>
    %c192_i32 = arith.constant 192 : i32
    %28 = vector.broadcast %c192_i32 : i32 to vector<128x1xi32>
    %29 = arith.addi %27, %28 : vector<128x1xi32>
    %30 = vector.broadcast %29 : vector<128x1xi32> to vector<128x256xi32>
    %31 = arith.cmpi eq, %1, %30 : vector<128x256xi32>
    %32 = arith.extui %31 : vector<128x256xi1> to vector<128x256xi32>
    %33 = arith.sitofp %32 : vector<128x256xi32> to vector<128x256xf32>
    %34 = arith.addf %26, %33 : vector<128x256xf32>
    %c0_1 = arith.constant 0 : index
    %c0_2 = arith.constant 0 : index
    %35 = vector.load %arg2[%c0_1, %c0_2] : memref<256x64xf32, #tpu.memory_space<vmem>>, vector<256x64xf32>
    %cst_3 = arith.constant dense<0.000000e+00> : vector<128x64xf32>
    %36 = tpu.matmul %34, %35, %cst_3 {dimension_numbers = #tpu.dot_dimension_numbers<[1], [0], [0], [1], [0, 0, 1, 1], [], []>} : vector<128x256xf32>, vector<256x64xf32>, vector<128x64xf32> -> vector<128x64xf32>
    %c0_4 = arith.constant 0 : index
    %c0_5 = arith.constant 0 : index
    %37 = vector.load %arg3[%c0_4, %c0_5] : memref<64x128xf32, #tpu.memory_space<vmem>>, vector<64x128xf32>
    %cst_6 = arith.constant dense<0.000000e+00> : vector<128x128xf32>
    %38 = tpu.matmul %36, %37, %cst_6 {dimension_numbers = #tpu.dot_dimension_numbers<[1], [0], [0], [1], [0, 0, 1, 1], [], []>} : vector<128x64xf32>, vector<64x128xf32>, vector<128x128xf32> -> vector<128x128xf32>
    %c0_7 = arith.constant 0 : index
    %c0_8 = arith.constant 0 : index
    %39 = vector.load %arg4[%c0_7, %c0_8] : memref<1x128xf32, #tpu.memory_space<vmem>>, vector<1x128xf32>
    %40 = vector.broadcast %39 : vector<1x128xf32> to vector<128x128xf32>
    %41 = arith.addf %38, %40 : vector<128x128xf32>
    %cst_9 = arith.constant 0.000000e+00 : f32
    %42 = vector.broadcast %cst_9 : f32 to vector<128x128xf32>
    %43 = arith.maximumf %41, %42 : vector<128x128xf32>
    %c0_10 = arith.constant 0 : index
    %c0_11 = arith.constant 0 : index
    %44 = vector.load %arg5[%c0_10, %c0_11] : memref<128x128xf32, #tpu.memory_space<vmem>>, vector<128x128xf32>
    %cst_12 = arith.constant dense<0.000000e+00> : vector<128x128xf32>
    %45 = tpu.matmul %43, %44, %cst_12 {dimension_numbers = #tpu.dot_dimension_numbers<[1], [0], [0], [1], [0, 0, 1, 1], [], []>} : vector<128x128xf32>, vector<128x128xf32>, vector<128x128xf32> -> vector<128x128xf32>
    %c0_13 = arith.constant 0 : index
    %c0_14 = arith.constant 0 : index
    %46 = vector.load %arg6[%c0_13, %c0_14] : memref<1x128xf32, #tpu.memory_space<vmem>>, vector<1x128xf32>
    %47 = vector.broadcast %46 : vector<1x128xf32> to vector<128x128xf32>
    %48 = arith.addf %45, %47 : vector<128x128xf32>
    %cst_15 = arith.constant dense<0xFF800000> : vector<128xf32>
    %49 = vector.multi_reduction <maximumf>, %48, %cst_15 [1] : vector<128x128xf32> to vector<128xf32>
    %50 = vector.shape_cast %49 : vector<128xf32> to vector<128x1xf32>
    %51 = vector.broadcast %50 : vector<128x1xf32> to vector<128x128xf32>
    %52 = arith.subf %48, %51 : vector<128x128xf32>
    %53 = math.exp %52 : vector<128x128xf32>
    %cst_16 = arith.constant dense<0.000000e+00> : vector<128xf32>
    %54 = vector.multi_reduction <add>, %53, %cst_16 [1] : vector<128x128xf32> to vector<128xf32>
    %55 = vector.shape_cast %54 : vector<128xf32> to vector<128x1xf32>
    %56 = math.log %55 : vector<128x1xf32>
    %57 = vector.broadcast %56 : vector<128x1xf32> to vector<128x128xf32>
    %58 = arith.subf %52, %57 : vector<128x128xf32>
    %c0_17 = arith.constant 0 : index
    %c0_18 = arith.constant 0 : index
    %59 = vector.load %arg7[%c0_17, %c0_18] : memref<128x128xf32, #tpu.memory_space<vmem>>, vector<128x128xf32>
    tpu.vector_store %arg7[%c0_17, %c0_18], %58 {strides = array<i32>} : memref<128x128xf32, #tpu.memory_space<vmem>>, vector<128x128xf32>,
    return
  }
  func.func @transform_0(%arg0: i32) -> (i32, i32) {
    %c0_i32 = arith.constant 0 : i32
    %c0_i32_0 = arith.constant 0 : i32
    return %arg0, %c0_i32 : i32, i32
  }
  func.func @transform_1(%arg0: i32) -> (i32, i32) {
    %c0_i32 = arith.constant 0 : i32
    %c0_i32_0 = arith.constant 0 : i32
    %c0_i32_1 = arith.constant 0 : i32
    return %c0_i32, %c0_i32_0 : i32, i32
  }
  func.func @transform_2(%arg0: i32) -> (i32, i32) {
    %c0_i32 = arith.constant 0 : i32
    %c0_i32_0 = arith.constant 0 : i32
    %c0_i32_1 = arith.constant 0 : i32
    return %c0_i32, %c0_i32_0 : i32, i32
  }
  func.func @transform_3(%arg0: i32) -> (i32, i32) {
    %c0_i32 = arith.constant 0 : i32
    %c0_i32_0 = arith.constant 0 : i32
    %c0_i32_1 = arith.constant 0 : i32
    return %c0_i32, %c0_i32_0 : i32, i32
  }
  func.func @transform_4(%arg0: i32) -> (i32, i32) {
    %c0_i32 = arith.constant 0 : i32
    %c0_i32_0 = arith.constant 0 : i32
    %c0_i32_1 = arith.constant 0 : i32
    return %c0_i32, %c0_i32_0 : i32, i32
  }
  func.func @transform_5(%arg0: i32) -> (i32, i32) {
    %c0_i32 = arith.constant 0 : i32
    %c0_i32_0 = arith.constant 0 : i32
    %c0_i32_1 = arith.constant 0 : i32
    return %c0_i32, %c0_i32_0 : i32, i32
  }
  func.func @transform_6(%arg0: i32) -> (i32, i32) {
    %c0_i32 = arith.constant 0 : i32
    %c0_i32_0 = arith.constant 0 : i32
    return %arg0, %c0_i32 : i32, i32
  }
}

</mosaic_0001>

<bundles_post_ra>
// kernel: cbow_forward.1
= control target key start
LH: loop header
LB: loop body
LE: loop exit
PB: predicated region body
PF: predicated region fallthrough
CT: control target
= control target key end

     0   :  { %11 = vsyncpa [#allocation3], 0  ;;  %s3025_s0 = inlined_call_operand.vmem [shape: s32[256,4], index: 0, kind: input, shape index: {}]   ;;  %s3026_s1 = inlined_call_operand.vmem [shape: f32[256,64], index: 1, kind: input, shape index: {}]   ;;  %s3027_s2 = inlined_call_operand.vmem [shape: f32[64,128], index: 2, kind: input, shape index: {}]   ;;  %s3028_s3 = inlined_call_operand.vmem [shape: f32[1,128], index: 3, kind: input, shape index: {}]   ;;  %s3029_s4 = inlined_call_operand.vmem [shape: f32[128,128], index: 4, kind: input, shape index: {}]   ;;  %s3030_s5 = inlined_call_operand.vmem [shape: f32[1,128], index: 5, kind: input, shape index: {}]   ;;  %s3031_s6 = inlined_call_operand.hbm [shape: f32[256,128], index: 6, kind: output, shape index: {}]  }
   0x1   :  { %13 = vsyncpa [#allocation3 + $0x1], 0  ;;  %s2103_s21 = smov 0   ;;  %s2105_s22 = smov 0  }
   0x2   :  { %s2107_s23 = smov 0   ;;  %s2109_s24 = smov 0  }
   0x3 LB: > { %s2124_s25 = sadd.s32 4294967295, %s2059_s24   ;;  %s1667_s26 = sadd.s32 4294967294, %s2059_s24   ;;  %s2059_s24 = sphi %s2109_s24, %s3037_s24   ;;  %s2055_s23 = sphi %s2107_s23, %s3036_s23   ;;  %s2051_s22 = sphi %s2105_s22, %s3035_s22   ;;  %s2047_s21 = sphi %s2103_s21, %s3034_s21  }
   0x4   : > { %s2128_s27 = sadd.s32 1, %s2059_s24   ;;  %s157_s28 = sadd.s32 1, %s2055_s23 }
   0x5   : > { %s154_s29 = ssub.s32 %s2059_s24, %s2128_s27  ;;  %p167_p0 = scmp.ne.s32.totalorder %s2055_s23, %s2051_s22 }
   0x6   : > { %p155_p1 = scmp.eq.s32.totalorder %s154_s29, 0  ;;  %p168_p2 = scmp.eq.s32.totalorder %s2124_s25, 1 }
   0x7   : > { %p173_p3 = scmp.ne.s32.totalorder %s2051_s22, %s2047_s21  ;;  %p174_p4 = scmp.eq.s32.totalorder %s1667_s26, 1 }
   0x8   : > { %s2139_s30 = scalar_select %p155_p1, %s2055_s23, %s157_s28  }
   0x9   : > { %p2141_p5 = por %p168_p2, %p167_p0  ;;  %p2145_p6 = por %p174_p4, %p173_p3 }
   0xa   : > { %p1670_p7 = scmp.ge.s32.totalorder %s2059_s24, 1  ;;  %p216_p8 = scmp.lt.s32.totalorder %s2059_s24, 3 }
   0xc   : > { %p217_p9 = pnand %p1670_p7, %p216_p8 }
   0xd   : > { %s1672_s9 = sshll.u32 (!%p217_p9), %s2124_s25, 4  ;;  %s243_s14 = sand.u32 (!%p217_p9), 1, %s2051_s22  }
   0xe   : > { %220 = sbr.rel (%p217_p9) target bundleno = 1020 (0x3fc), region = 44  ;;  %p247_p10 = scmp.lt.s32.totalorder (!%p217_p9), %s1672_s9, 31 }
   0xf   : > { %s1671_s15 = sshll.u32 (!%p217_p9), %s243_s14, 7  ;;  %s1823_s17 = sshll.u32 (!%p217_p9), %s2124_s25, 7 }
  0x10   : > { %s2954_s16 = scalar_lea.vmem (!%p217_p9), [#allocation2], %s1671_s15  ;;  %s1601_s20 = scalar_lea.hbm (!%p217_p9), %s3031_s6, %s1823_s17 }
  0x11   : > { %s1602_s26 = sshll.u32 (!%p217_p9), %s2954_s16, 4  ;;  %s1590_s28 = scalar_lea.sflag (!%p217_p9), [#allocation3], %s243_s14  ;;  %s1603_s26 = int_to_ptr.vmem [resolvable:$true] %s1602_s26 }
  0x12   : > { %s2017_s11 = scalar_lea.hbm (!%p217_p9), %s3031_s6, 256 }
  0x13   : > { %v2061_v0 = vmov 2   ;;  %v2062_v1 = vmov 1   ;;  %v2063_v2 = vmov 0   ;;  %s3039_s9 = smov (!%p247_p10, %s1672_s9), 31  ;;  %v2064_v11 = vmov 3   ;;  %v1039_v34 = vld [vmem:[%s3026_s1 + $0x78] sm:$0xff] }
  0x14   : > { %1872 = vset.pattern.permute.xlu1 %v2061_v0  ;;  %1870 = vset.pattern.permute.xlu0 %v2062_v1  ;;  %s1673_s10 = sshll.u32 %s3039_s9, 3  ;;  %v1055_v35 = vld [vmem:[%s3026_s1 + $0xf8] sm:$0xff]  ;;  %v1038_v36 = vld [vmem:[%s3026_s1 + $0x70] sm:$0xff]  ;;  %v1037_v39 = vld [vmem:[%s3026_s1 + $0x68] sm:$0xff] }
  0x15   : > { %1871 = vset.pattern.permute.xlu2 %v2063_v2  ;;  %s2158_s13 = scalar_lea.vmem %s3025_s0, %s1673_s10  ;;  %1056 = vmatpush.msra.mxu0 %v1039_v34  ;;  %v1054_v38 = vld [vmem:[%s3026_s1 + $0xf0] sm:$0xff]  ;;  %v1053_v40 = vld [vmem:[%s3026_s1 + $0xe8] sm:$0xff]  ;;  %v1036_v41 = vld [vmem:[%s3026_s1 + $0x60] sm:$0xff] }
  0x16   : > { %v253_v3 = vld [vmem:[%s2158_s13] sm:$0xff]  ;;  %v254_v4 = vld [vmem:[%s2158_s13 + $0x8] sm:$0xff]  ;;  %v255_v16 = vld [vmem:[%s2158_s13 + $0x10] sm:$0xff]  ;;  %1121 = vmatpush.msra.mxu1 %v1055_v35  ;;  %v2065_v35 = vmov 0.0  }
  0x17   : > { %v640_v5 = vadd.s32 128, %v253_v3  ;;  %v448_v6 = vadd.s32 64, %v253_v3  ;;  %276 = vperm.xlu2 %1871, %v254_v4   ;;  %v257_v7 = vld [vmem:[%s2158_s13 + $0x20] sm:$0xff]  ;;  %v449_v8 = vadd.s32 64, %v254_v4  ;;  %v832_v9 = vadd.s32 192, %v253_v3  ;;  %v258_v12 = vld [vmem:[%s2158_s13 + $0x28] sm:$0xff]  ;;  %1057 = vmatpush.msra.mxu0 %v1038_v36 }
  0x18   : > { %v644_v10 = vadd.s32 128, %v257_v7  ;;  %v833_v13 = vadd.s32 192, %v254_v4  ;;  %v641_v14 = vadd.s32 128, %v254_v4  ;;  %v837_v15 = vadd.s32 192, %v258_v12  ;;  %v256_v20 = vld [vmem:[%s2158_s13 + $0x18] sm:$0xff]  ;;  %v259_v29 = vld [vmem:[%s2158_s13 + $0x30] sm:$0xff]  ;;  %1122 = vmatpush.msra.mxu1 %v1054_v38 }
  0x19   : > { %657 = vperm.xlu1 %1872, %v640_v5   ;;  %465 = vperm.xlu0 %1870, %v448_v6   ;;  %v642_v17 = vadd.s32 128, %v255_v16  ;;  %v450_v18 = vadd.s32 64, %v255_v16  ;;  %v834_v19 = vadd.s32 192, %v255_v16  ;;  %v835_v21 = vadd.s32 192, %v256_v20  ;;  %v2178_v22 = vld [vmem:[%s2158_s13 + $0x38] sm:$0xff]  ;;  %v2192_v31 = vld [vmem:[%s2158_s13 + $0x40] sm:$0xff] }
  0x1a   : > { %v643_v23 = vadd.s32 128, %v256_v20  ;;  %v451_v24 = vadd.s32 64, %v256_v20  ;;  %v452_v25 = vadd.s32 64, %v257_v7  ;;  %v836_v26 = vadd.s32 192, %v257_v7  ;;  %1058 = vmatpush.msra.mxu0 %v1037_v39  ;;  %1123 = vmatpush.msra.mxu1 %v1053_v40  ;;  %v1052_v42 = vld [vmem:[%s3026_s1 + $0xe0] sm:$0xff]  ;;  %v2226_v44 = vld [vmem:[%s2158_s13 + $0x48] sm:$0xff] }
  0x1b   : > { %v645_v27 = vadd.s32 128, %v258_v12  ;;  %v453_v28 = vadd.s32 64, %v258_v12  ;;  %v454_v30 = vadd.s32 64, %v259_v29  ;;  %v456_v32 = vadd.s32 64, %v2192_v31  ;;  %v1035_v45 = vld [vmem:[%s3026_s1 + $0x58] sm:$0xff]  ;;  %v1034_v48 = vld [vmem:[%s3026_s1 + $0x50] sm:$0xff] }
  0x1c   : > { %v838_v33 = vadd.s32 192, %v259_v29  ;;  %v646_v37 = vadd.s32 128, %v259_v29  ;;  %v647_v43 = vadd.s32 128, %v2178_v22  ;;  %1059 = vmatpush.msra.mxu0 %v1036_v41  ;;  %1124 = vmatpush.msra.mxu1 %v1052_v42  ;;  %v1051_v46 = vld [vmem:[%s3026_s1 + $0xd8] sm:$0xff]  ;;  %v649_v47 = vadd.s32 128, %v2226_v44  ;;  %v1050_v50 = vld [vmem:[%s3026_s1 + $0xd0] sm:$0xff] }
  0x1d   : > { %v455_v49 = vadd.s32 64, %v2178_v22  ;;  %v1033_v51 = vld [vmem:[%s3026_s1 + $0x48] sm:$0xff]  ;;  %v1032_v54 = vld [vmem:[%s3026_s1 + $0x40] sm:$0xff]  ;;  %v1031_v56 = vld [vmem:[%s3026_s1 + $0x38] sm:$0xff]  ;;  %v839_v60 = vadd.s32 192, %v2178_v22 }
  0x1e   : > { %1060 = vmatpush.msra.mxu0 %v1035_v45  ;;  %1125 = vmatpush.msra.mxu1 %v1051_v46  ;;  %v1049_v53 = vld [vmem:[%s3026_s1 + $0xc8] sm:$0xff]  ;;  %v1048_v55 = vld [vmem:[%s3026_s1 + $0xc0] sm:$0xff]  ;;  %v1047_v57 = vld [vmem:[%s3026_s1 + $0xb8] sm:$0xff] }
  0x1f   : > { %1874 = vset.pattern.permute.xlu2 %v2062_v1  ;;  %v1030_v58 = vld [vmem:[%s3026_s1 + $0x30] sm:$0xff]  ;;  %v1029_v61 = vld [vmem:[%s3026_s1 + $0x28] sm:$0xff]  ;;  %v1028_v63 = vld [vmem:[%s3026_s1 + $0x20] sm:$0xff] }
  0x20   : > { %468 = vperm.xlu2 %1874, %v449_v8   ;;  %1061 = vmatpush.msra.mxu0 %v1034_v48  ;;  %v1046_v59 = vld [vmem:[%s3026_s1 + $0xb0] sm:$0xff]  ;;  %v1045_v62 = vld [vmem:[%s3026_s1 + $0xa8] sm:$0xff]  ;;  %v1044_v4 = vld [vmem:[%s3026_s1 + $0xa0] sm:$0xff] }
  0x21   : > { %1873 = vset.pattern.permute.xlu1 %v2064_v11  ;;  %1885 = vset.pattern.permute.xlu0 %v2061_v0  ;;  %v1027_v5 = vld [vmem:[%s3026_s1 + $0x18] sm:$0xff]  ;;  %v1026_v8 = vld [vmem:[%s3026_s1 + $0x10] sm:$0xff] }
  0x22   : > { %849 = vperm.xlu1 %1873, %v832_v9   ;;  %669 = vperm.xlu0 %1885, %v644_v10   ;;  %v1043_v6 = vld [vmem:[%s3026_s1 + $0x98] sm:$0xff]  ;;  %v1042_v9 = vld [vmem:[%s3026_s1 + $0x90] sm:$0xff]  ;;  %v648_v10 = vadd.s32 128, %v2192_v31 }
  0x23   : > { %1126 = vmatpush.msra.mxu1 %v1050_v50  ;;  %1062 = vmatpush.msra.mxu0 %v1033_v51 }
  0x25   : > { %1127 = vmatpush.msra.mxu1 %v1049_v53  ;;  %1063 = vmatpush.msra.mxu0 %v1032_v54 }
  0x27   : > { %1128 = vmatpush.msra.mxu1 %v1048_v55  ;;  %1064 = vmatpush.msra.mxu0 %v1031_v56  ;;  %v264_v56 = vld [vmem:[%s2158_s13 + $0x58] sm:$0xff] }
  0x28   : > { %1876 = vset.pattern.permute.xlu2 %v2064_v11 }
  0x29   : > { %852 = vperm.xlu2 %1876, %v833_v13   ;;  %1129 = vmatpush.msra.mxu1 %v1047_v57  ;;  %v1025_v13 = vld [vmem:[%s3026_s1 + $0x8] sm:$0xff] }
  0x2a   : > { %1875 = vset.pattern.permute.xlu1 %v2061_v0  ;;  %1890 = vset.pattern.permute.xlu0 %v2064_v11  ;;  %v2414_v57 = vld [vmem:[%s2158_s13 + $0x68] sm:$0xff] }
  0x2b   : > { %660 = vperm.xlu1 %1875, %v641_v14   ;;  %864 = vperm.xlu0 %1890, %v837_v15  }
  0x2c   : > { %1065 = vmatpush.msra.mxu0 %v1030_v58  ;;  %1130 = vmatpush.msra.mxu1 %v1046_v59 }
  0x2e   : > { %1066 = vmatpush.msra.mxu0 %v1029_v61  ;;  %1131 = vmatpush.msra.mxu1 %v1045_v62  ;;  %v461_v61 = vadd.s32 64, %v2414_v57 }
  0x30   : > { %1067 = vmatpush.msra.mxu0 %v1028_v63  ;;  %1132 = vmatpush.msra.mxu1 %v1044_v4 }
  0x31   : > { %1878 = vset.pattern.permute.xlu2 %v2061_v0 }
  0x32   : > { %663 = vperm.xlu2 %1878, %v642_v17   ;;  %1068 = vmatpush.msra.mxu0 %v1027_v5 }
  0x33   : > { %1877 = vset.pattern.permute.xlu1 %v2062_v1  ;;  %1891 = vset.pattern.permute.xlu0 %v2063_v2 }
  0x34   : > { %471 = vperm.xlu1 %1877, %v450_v18   ;;  %273 = vperm.xlu0 %1891, %v253_v3  }
  0x35   : > { %1133 = vmatpush.msra.mxu1 %v1043_v6  ;;  %1069 = vmatpush.msra.mxu0 %v1026_v8 }
  0x37   : > { %1134 = vmatpush.msra.mxu1 %v1042_v9  ;;  %1070 = vmatpush.msra.mxu0 %v1025_v13 }
  0x3a   : > { %1880 = vset.pattern.permute.xlu2 %v2063_v2 }
  0x3b   : > { %282 = vperm.xlu2 %1880, %v256_v20   ;;  %v1040_v20 = vld [vmem:[%s3026_s1 + $0x80] sm:$0xff] }
  0x3c   : > { %1879 = vset.pattern.permute.xlu1 %v2064_v11  ;;  %279 = vperm.xlu0 %1891, %v255_v16   ;;  %v1041_v16 = vld [vmem:[%s3026_s1 + $0x88] sm:$0xff] }
  0x3d   : > { %855 = vperm.xlu1 %1879, %v834_v19   ;;  %v1024_v19 = vld [vmem:[%s3026_s1] sm:$0xff]  ;;  %1135 = vmatpush.msra.mxu1 %v1041_v16 }
  0x3e   : > { %1071 = vmatpush.msra.mxu0 %v1024_v19 }
  0x3f   : > { %1136 = vmatpush.msra.mxu1 %v1040_v20 }
  0x43   : > { %1882 = vset.pattern.permute.xlu2 %v2064_v11 }
  0x44   : > { %294 = vperm.xlu0 %1891, %v2178_v22   ;;  %858 = vperm.xlu2 %1882, %v835_v21   ;;  %v457_v21 = vadd.s32 64, %v2226_v44 }
  0x45   : > { %1881 = vset.pattern.permute.xlu1 %v2061_v0 }
  0x46   : > { %666 = vperm.xlu1 %1881, %v643_v23  }
  0x4c   : > { %1896 = vset.pattern.permute.xlu0 %v2062_v1  ;;  %1884 = vset.pattern.permute.xlu2 %v2062_v1 }
  0x4d   : > { %474 = vperm.xlu0 %1896, %v451_v24   ;;  %477 = vperm.xlu2 %1884, %v452_v25   ;;  %v269_v25 = vlaneseq }
  0x4e   : > { %1883 = vset.pattern.permute.xlu1 %v2063_v2 }
  0x4f   : > { %285 = vperm.xlu1 %1883, %v257_v7   ;;  %v840_v7 = vadd.s32 192, %v2192_v31 }
  0x55   : > { %1887 = vset.pattern.permute.xlu2 %v2063_v2  ;;  %489 = vperm.xlu0 %1896, %v456_v32   ;;  %v2346_v32 = vld [vmem:[%s2158_s13 + $0x60] sm:$0xff] }
  0x56   : > { %288 = vperm.xlu2 %1887, %v258_v12   ;;  %v263_v12 = vld [vmem:[%s2158_s13 + $0x50] sm:$0xff] }
  0x57   : > { %1886 = vset.pattern.permute.xlu1 %v2064_v11  ;;  %v842_v17 = vadd.s32 192, %v263_v12  ;;  %v458_v34 = vadd.s32 64, %v263_v12 }
  0x58   : > { %861 = vperm.xlu1 %1886, %v836_v26   ;;  %v841_v26 = vadd.s32 192, %v2226_v44 }
  0x5d   : > { %1905 = vset.pattern.permute.xlu0 %v2061_v0 }
  0x5e   : > { %1889 = vset.pattern.permute.xlu2 %v2061_v0  ;;  %684 = vperm.xlu0 %1905, %v649_v47  }
  0x5f   : > { %672 = vperm.xlu2 %1889, %v645_v27   ;;  %v2334_v27 = vand.u32 127, %v269_v25 }
  0x60   : > { %1888 = vset.pattern.permute.xlu1 %v2062_v1 }
  0x61   : > { %480 = vperm.xlu1 %1888, %v453_v28  }
  0x66   : > { %1910 = vset.pattern.permute.xlu0 %v2064_v11 }
  0x67   : > { %1893 = vset.pattern.permute.xlu2 %v2062_v1  ;;  %879 = vperm.xlu0 %1910, %v842_v17  }
  0x68   : > { %483 = vperm.xlu2 %1893, %v454_v30  }
  0x69   : > { %1892 = vset.pattern.permute.xlu1 %v2063_v2 }
  0x6a   : > { %291 = vperm.xlu1 %1892, %v259_v29  }
  0x6f   : > { %1915 = vset.pattern.permute.xlu0 %v2063_v2 }
  0x70   : > { %1895 = vset.pattern.permute.xlu2 %v2064_v11  ;;  %309 = vperm.xlu0 %1915, %v2346_v32  }
  0x71   : > { %867 = vperm.xlu2 %1895, %v838_v33   ;;  %v2246_v52 = vpop.permute.xlu2 %276  ;;  %v650_v33 = vadd.s32 128, %v263_v12 }
  0x72   : > { %1894 = vset.pattern.permute.xlu1 %v2061_v0  ;;  %vm322_vm0 = vcmp.eq.s32.totalorder %v2334_v27, %v2246_v52 }
  0x73   : > { %675 = vperm.xlu1 %1894, %v646_v37   ;;  %v1676_v36 = vsel %vm322_vm0, 1.0, %v2065_v35 }
  0x78   : > { %1920 = vset.pattern.permute.xlu0 %v2062_v1 }
  0x79   : > { %1898 = vset.pattern.permute.xlu2 %v2061_v0  ;;  %504 = vperm.xlu0 %1920, %v461_v61  }
  0x7a   : > { %678 = vperm.xlu2 %1898, %v647_v43   ;;  %v2284_v3 = vpop.permute.xlu2 %468 }
  0x7b   : > { %1897 = vset.pattern.permute.xlu1 %v2062_v1  ;;  %vm514_vm4 = vcmp.eq.s32.totalorder %v2334_v27, %v2284_v3 }
  0x7c   : > { %486 = vperm.xlu1 %1897, %v455_v49   ;;  %v1708_v48 = vsel %vm514_vm4, 1.0, %v2065_v35 }
  0x7d   : > { %v610_v62 = vadd.f32 %v1708_v48, %v1676_v36 }
  0x81   : > { %1925 = vset.pattern.permute.xlu0 %v2061_v0 }
  0x82   : > { %1900 = vset.pattern.permute.xlu2 %v2063_v2 }
  0x83   : > { %297 = vperm.xlu2 %1900, %v2192_v31   ;;  %v2313_v18 = vpop.permute.xlu2 %852  ;;  %v2343_v31 = vadd.s32 128, %v2334_v27 }
  0x84   : > { %1899 = vset.pattern.permute.xlu1 %v2064_v11  ;;  %vm898_vm14 = vcmp.eq.s32.totalorder %v2334_v27, %v2313_v18 }
  0x85   : > { %870 = vperm.xlu1 %1899, %v839_v60   ;;  %vm323_vm3 = vcmp.eq.s32.totalorder %v2343_v31, %v2246_v52  ;;  %vm515_vm9 = vcmp.eq.s32.totalorder %v2343_v31, %v2284_v3  ;;  %v459_v60 = vadd.s32 64, %v264_v56  ;;  %vm899_vm15 = vcmp.eq.s32.totalorder %v2343_v31, %v2313_v18 }
  0x86   : > { %v1677_v45 = vsel %vm323_vm3, 1.0, %v2065_v35  ;;  %v1709_v50 = vsel %vm515_vm9, 1.0, %v2065_v35  ;;  %v651_v18 = vadd.s32 128, %v264_v56 }
  0x87   : > { %v611_v63 = vadd.f32 %v1709_v50, %v1677_v45 }
  0x8b   : > { %v2307_v14 = vpop.permute.xlu1 %657  ;;  %v466_v15 = vpop.permute.xlu0 %465  ;;  %1902 = vset.pattern.permute.xlu2 %v2064_v11 }
  0x8c   : > { %873 = vperm.xlu2 %1902, %v840_v7   ;;  %v2329_v24 = vpop.permute.xlu2 %663  ;;  %vm512_vm1 = vcmp.eq.s32.totalorder %v2334_v27, %v466_v15  ;;  %vm513_vm2 = vcmp.eq.s32.totalorder %v2343_v31, %v466_v15  ;;  %vm704_vm5 = vcmp.eq.s32.totalorder %v2334_v27, %v2307_v14  ;;  %vm705_vm6 = vcmp.eq.s32.totalorder %v2343_v31, %v2307_v14 }
  0x8d   : > { %1901 = vset.pattern.permute.xlu1 %v2061_v0  ;;  %v1706_v37 = vsel %vm512_vm1, 1.0, %v2065_v35  ;;  %v1707_v38 = vsel %vm513_vm2, 1.0, %v2065_v35  ;;  %v1738_v46 = vsel %vm704_vm5, 1.0, %v2065_v35  ;;  %v1739_v47 = vsel %vm705_vm6, 1.0, %v2065_v35 }
  0x8e   : > { %681 = vperm.xlu1 %1901, %v648_v10   ;;  %v1772_v10 = vsel %vm898_vm14, 1.0, %v2065_v35  ;;  %vm708_vm4 = vcmp.eq.s32.totalorder %v2334_v27, %v2329_v24  ;;  %vm709_vm5 = vcmp.eq.s32.totalorder %v2343_v31, %v2329_v24 }
  0x8f   : > { %v1742_v25 = vsel %vm708_vm4, 1.0, %v2065_v35 }
  0x94   : > { %v2323_v22 = vpop.permute.xlu1 %849  ;;  %v2325_v23 = vpop.permute.xlu0 %669  ;;  %1904 = vset.pattern.permute.xlu2 %v2062_v1 }
  0x95   : > { %492 = vperm.xlu2 %1904, %v457_v21   ;;  %v2340_v30 = vpop.permute.xlu2 %282  ;;  %vm896_vm10 = vcmp.eq.s32.totalorder %v2334_v27, %v2323_v22  ;;  %vm897_vm11 = vcmp.eq.s32.totalorder %v2343_v31, %v2323_v22  ;;  %v843_v22 = vadd.s32 192, %v264_v56  ;;  %vm712_vm4 = vcmp.eq.s32.totalorder %v2334_v27, %v2325_v23 }
  0x96   : > { %1903 = vset.pattern.permute.xlu1 %v2063_v2  ;;  %v1770_v54 = vsel %vm896_vm10, 1.0, %v2065_v35  ;;  %v1771_v55 = vsel %vm897_vm11, 1.0, %v2065_v35  ;;  %vm327_vm9 = vcmp.eq.s32.totalorder %v2343_v31, %v2340_v30 }
  0x97   : > { %300 = vperm.xlu1 %1903, %v2226_v44  }
  0x9d   : > { %v661_v28 = vpop.permute.xlu1 %660  ;;  %v2336_v29 = vpop.permute.xlu0 %864  ;;  %1907 = vset.pattern.permute.xlu2 %v2063_v2 }
  0x9e   : > { %303 = vperm.xlu2 %1907, %v263_v12   ;;  %vm706_vm12 = vcmp.eq.s32.totalorder %v2334_v27, %v661_v28  ;;  %v2395_v49 = vpop.permute.xlu2 %858  ;;  %vm707_vm13 = vcmp.eq.s32.totalorder %v2343_v31, %v661_v28  ;;  %v1773_v12 = vsel %vm899_vm15, 1.0, %v2065_v35 }
  0x9f   : > { %1906 = vset.pattern.permute.xlu1 %v2064_v11  ;;  %v1740_v53 = vsel %vm706_vm12, 1.0, %v2065_v35  ;;  %v1741_v3 = vsel %vm707_vm13, 1.0, %v2065_v35 }
  0xa0   : > { %876 = vperm.xlu1 %1906, %v841_v26   ;;  %v802_v6 = vadd.f32 %v1740_v53, %v610_v62  ;;  %v803_v7 = vadd.f32 %v1741_v3, %v611_v63  ;;  %v1743_v26 = vsel %vm709_vm5, 1.0, %v2065_v35  ;;  %vm713_vm5 = vcmp.eq.s32.totalorder %v2343_v31, %v2325_v23 }
  0xa1   : > { %v844_v23 = vadd.s32 192, %v2346_v32 }
  0xa2   : > { %v994_v19 = vadd.f32 %v1772_v10, %v802_v6  ;;  %v995_v20 = vadd.f32 %v1773_v12, %v803_v7  ;;  %v1746_v7 = vsel %vm712_vm4, 1.0, %v2065_v35 }
  0xa6   : > { %v2360_v39 = vpop.permute.xlu1 %471  ;;  %v274_v40 = vpop.permute.xlu0 %273  ;;  %1909 = vset.pattern.permute.xlu2 %v2061_v0 }
  0xa7   : > { %vm320_vm7 = vcmp.eq.s32.totalorder %v2334_v27, %v274_v40  ;;  %vm321_vm8 = vcmp.eq.s32.totalorder %v2343_v31, %v274_v40  ;;  %687 = vperm.xlu2 %1909, %v650_v33   ;;  %vm516_vm2 = vcmp.eq.s32.totalorder %v2334_v27, %v2360_v39  ;;  %vm517_vm3 = vcmp.eq.s32.totalorder %v2343_v31, %v2360_v39  ;;  %v478_v15 = vpop.permute.xlu2 %477 }
  0xa8   : > { %v1674_v41 = vsel %vm320_vm7, 1.0, %v2065_v35  ;;  %v1675_v42 = vsel %vm321_vm8, 1.0, %v2065_v35  ;;  %1908 = vset.pattern.permute.xlu1 %v2062_v1  ;;  %v1710_v13 = vsel %vm516_vm2, 1.0, %v2065_v35  ;;  %v1711_v14 = vsel %vm517_vm3, 1.0, %v2065_v35 }
  0xa9   : > { %v608_v43 = vadd.f32 %v1706_v37, %v1674_v41  ;;  %v609_v44 = vadd.f32 %v1707_v38, %v1675_v42  ;;  %495 = vperm.xlu1 %1908, %v458_v34   ;;  %vm326_vm8 = vcmp.eq.s32.totalorder %v2334_v27, %v2340_v30  ;;  %v1681_v41 = vsel %vm327_vm9, 1.0, %v2065_v35 }
  0xaa   : > { %v1680_v40 = vsel %vm326_vm8, 1.0, %v2065_v35  ;;  %v460_v42 = vadd.s32 64, %v2346_v32  ;;  %vm520_vm10 = vcmp.eq.s32.totalorder %v2334_v27, %v478_v15  ;;  %vm521_vm11 = vcmp.eq.s32.totalorder %v2343_v31, %v478_v15 }
  0xab   : > { %v800_v51 = vadd.f32 %v1738_v46, %v608_v43  ;;  %v801_v52 = vadd.f32 %v1739_v47, %v609_v44  ;;  %v2467_v43 = vld [vmem:[%s2158_s13 + $0x70] sm:$0xff]  ;;  %v652_v44 = vadd.s32 128, %v2346_v32 }
  0xac   : > { %v654_v45 = vadd.s32 128, %v2467_v43 }
  0xad   : > { %v992_v58 = vadd.f32 %v1770_v54, %v800_v51  ;;  %v993_v59 = vadd.f32 %v1771_v55, %v801_v52  ;;  %v1714_v54 = vsel %vm520_vm10, 1.0, %v2065_v35  ;;  %v1715_v55 = vsel %vm521_vm11, 1.0, %v2065_v35 }
  0xae   : > { %v280_v4 = vpop.permute.xlu0 %279  ;;  %699 = vperm.xlu0 %1925, %v654_v45  }
  0xaf   : > { %vm324_vm0 = vcmp.eq.s32.totalorder %v2334_v27, %v280_v4  ;;  %vm325_vm1 = vcmp.eq.s32.totalorder %v2343_v31, %v280_v4  ;;  %v856_v5 = vpop.permute.xlu1 %855  ;;  %1072 = vmatmul.f32.vlgmr.msra.gmra.mxu0 %v992_v58  ;;  %1137 = vmatmul.f32.vlgmr.msra.gmra.mxu1 %v993_v59 }
  0xb0   : > { %1912 = vset.pattern.permute.xlu2 %v2062_v1  ;;  %v1678_v8 = vsel %vm324_vm0, 1.0, %v2065_v35  ;;  %v1679_v9 = vsel %vm325_vm1, 1.0, %v2065_v35  ;;  %vm900_vm6 = vcmp.eq.s32.totalorder %v2334_v27, %v856_v5  ;;  %vm901_vm7 = vcmp.eq.s32.totalorder %v2343_v31, %v856_v5  ;;  %v2461_v37 = vpop.permute.xlu2 %288 }
  0xb1   : > { %1911 = vset.pattern.permute.xlu1 %v2063_v2  ;;  %498 = vperm.xlu2 %1912, %v459_v60   ;;  %v612_v16 = vadd.f32 %v1710_v13, %v1678_v8  ;;  %v613_v17 = vadd.f32 %v1711_v14, %v1679_v9  ;;  %v1774_v34 = vsel %vm900_vm6, 1.0, %v2065_v35  ;;  %v1775_v36 = vsel %vm901_vm7, 1.0, %v2065_v35 }
  0xb2   : > { %306 = vperm.xlu1 %1911, %v264_v56   ;;  %vm902_vm0 = vcmp.eq.s32.totalorder %v2334_v27, %v2395_v49  ;;  %vm903_vm1 = vcmp.eq.s32.totalorder %v2343_v31, %v2395_v49  ;;  %v1747_v8 = vsel %vm713_vm5, 1.0, %v2065_v35  ;;  %vm330_vm8 = vcmp.eq.s32.totalorder %v2334_v27, %v2461_v37 }
  0xb3   : > { %v804_v24 = vadd.f32 %v1742_v25, %v612_v16  ;;  %v805_v33 = vadd.f32 %v1743_v26, %v613_v17  ;;  %v1776_v61 = vsel %vm902_vm0, 1.0, %v2065_v35  ;;  %v1777_v62 = vsel %vm903_vm1, 1.0, %v2065_v35  ;;  %v2521_v16 = vld [vmem:[%s2158_s13 + $0x78] sm:$0xff]  ;;  %s1604_s13 = sshll.u32 %s1601_s20, 4  ;;  %s1605_s13 = int_to_ptr.hbm [resolvable:$true] %s1604_s13 }
  0xb4   : > { %vm331_vm9 = vcmp.eq.s32.totalorder %v2343_v31, %v2461_v37  ;;  %v845_v17 = vadd.s32 192, %v2414_v57  ;;  %s2011_s29 = sshra.s32 %s1605_s13, 4  ;;  %s2012_s29 = int_to_ptr.hbm [resolvable:$true] %s2011_s29 }
  0xb5   : > { %v996_v38 = vadd.f32 %v1774_v34, %v804_v24  ;;  %v997_v39 = vadd.f32 %v1775_v36, %v805_v33  ;;  %v1685_v25 = vsel %vm331_vm9, 1.0, %v2065_v35  ;;  %s2013_s25 = scalar_lea.hbm %s2012_s29, 128  ;;  %p2018_p0 = scmp.lt.s32.totalorder %s2012_s29, %s3031_s6 }
  0xb6   : > { %v2446_v21 = vpop.permute.xlu0 %294  ;;  %1930 = vset.pattern.permute.xlu0 %v2064_v11  ;;  %p2014_p11 = scmp.ne.s32.totalorder %s2012_s29, %s2013_s25  ;;  %p2019_p1 = scmp.lt.s32.totalorder %s2017_s11, %s2013_s25 }
  0xb7   : > { %1075 = vmatmul.f32.gmra.mxu0 %v994_v19  ;;  %1140 = vmatmul.f32.gmra.mxu1 %v995_v20  ;;  %v847_v19 = vadd.s32 192, %v2521_v16  ;;  %v653_v20 = vadd.s32 128, %v2414_v57 }
  0xb8   : > { %v667_v28 = vpop.permute.xlu1 %666  ;;  %p2015_p12 = pnand %p2014_p11, %p2141_p5  ;;  %p2020_p2 = por %p2019_p1, %p2018_p0 }
  0xb9   : > { %1914 = vset.pattern.permute.xlu2 %v2064_v11  ;;  %vm710_vm12 = vcmp.eq.s32.totalorder %v2334_v27, %v667_v28  ;;  %vm711_vm13 = vcmp.eq.s32.totalorder %v2343_v31, %v667_v28  ;;  %v673_v4 = vpop.permute.xlu2 %672  ;;  %894 = vperm.xlu0 %1930, %v847_v19  }
  0xba   : > { %1913 = vset.pattern.permute.xlu1 %v2061_v0  ;;  %882 = vperm.xlu2 %1914, %v843_v22   ;;  %v1744_v52 = vsel %vm710_vm12, 1.0, %v2065_v35  ;;  %v1745_v53 = vsel %vm711_vm13, 1.0, %v2065_v35  ;;  %vm714_vm10 = vcmp.eq.s32.totalorder %v2334_v27, %v673_v4  ;;  %vm715_vm11 = vcmp.eq.s32.totalorder %v2343_v31, %v673_v4  ;;  %p2016_p13 = pneg %p2015_p12 }
  0xbb   : > { %690 = vperm.xlu1 %1913, %v651_v18   ;;  %vm906_vm12 = vcmp.eq.s32.totalorder %v2334_v27, %v2336_v29  ;;  %vm907_vm13 = vcmp.eq.s32.totalorder %v2343_v31, %v2336_v29  ;;  %v1684_v18 = vsel %vm330_vm8, 1.0, %v2065_v35  ;;  %v1748_v28 = vsel %vm714_vm10, 1.0, %v2065_v35 }
  0xbc   : > { %v1749_v24 = vsel %vm715_vm11, 1.0, %v2065_v35  ;;  %v1780_v36 = vsel %vm906_vm12, 1.0, %v2065_v35  ;;  %v1781_v37 = vsel %vm907_vm13, 1.0, %v2065_v35  ;;  %vm334_vm10 = vcmp.eq.s32.totalorder %v2334_v27, %v2446_v21  ;;  %p2021_p3 = pnand %p2020_p2, %p2016_p13 }
  0xbd   : > { %vm335_vm11 = vcmp.eq.s32.totalorder %v2343_v31, %v2446_v21 }
  0xbf   : > { %1078 = vmatmul.f32.gmra.mxu0 %v996_v38  ;;  %1143 = vmatmul.f32.gmra.mxu1 %v997_v39  ;;  %v475_v30 = vpop.permute.xlu0 %474 }
  0xc0   : > { %vm518_vm14 = vcmp.eq.s32.totalorder %v2334_v27, %v475_v30  ;;  %vm519_vm15 = vcmp.eq.s32.totalorder %v2343_v31, %v475_v30  ;;  %v462_v30 = vadd.s32 64, %v2467_v43 }
  0xc1   : > { %v1712_v46 = vsel %vm518_vm14, 1.0, %v2065_v35  ;;  %v1713_v47 = vsel %vm519_vm15, 1.0, %v2065_v35  ;;  %v286_v48 = vpop.permute.xlu1 %285 }
  0xc2   : > { %v614_v50 = vadd.f32 %v1712_v46, %v1680_v40  ;;  %v615_v51 = vadd.f32 %v1713_v47, %v1681_v41  ;;  %vm328_vm2 = vcmp.eq.s32.totalorder %v2334_v27, %v286_v48  ;;  %vm329_vm3 = vcmp.eq.s32.totalorder %v2343_v31, %v286_v48  ;;  %1917 = vset.pattern.permute.xlu2 %v2061_v0  ;;  %v484_v15 = vpop.permute.xlu2 %483 }
  0xc3   : > { %1916 = vset.pattern.permute.xlu1 %v2062_v1  ;;  %693 = vperm.xlu2 %1917, %v652_v44   ;;  %v1682_v56 = vsel %vm328_vm2, 1.0, %v2065_v35  ;;  %v1683_v58 = vsel %vm329_vm3, 1.0, %v2065_v35  ;;  %vm524_vm0 = vcmp.eq.s32.totalorder %v2334_v27, %v484_v15  ;;  %vm525_vm1 = vcmp.eq.s32.totalorder %v2343_v31, %v484_v15 }
  0xc4   : > { %501 = vperm.xlu1 %1916, %v460_v42   ;;  %v806_v59 = vadd.f32 %v1744_v52, %v614_v50  ;;  %v807_v60 = vadd.f32 %v1745_v53, %v615_v51  ;;  %v616_v5 = vadd.f32 %v1714_v54, %v1682_v56  ;;  %v617_v6 = vadd.f32 %v1715_v55, %v1683_v58 }
  0xc5   : > { %v1718_v45 = vsel %vm524_vm0, 1.0, %v2065_v35  ;;  %v1719_v46 = vsel %vm525_vm1, 1.0, %v2065_v35  ;;  %v846_v50 = vadd.s32 192, %v2467_v43 }
  0xc6   : > { %v998_v63 = vadd.f32 %v1776_v61, %v806_v59  ;;  %v999_v3 = vadd.f32 %v1777_v62, %v807_v60  ;;  %v808_v49 = vadd.f32 %v1746_v7, %v616_v5  ;;  %v809_v10 = vadd.f32 %v1747_v8, %v617_v6 }
  0xc7   : > { %v655_v62 = vadd.s32 128, %v2521_v16  ;;  %v1689_v5 = vsel %vm335_vm11, 1.0, %v2065_v35 }
  0xc8   : > { %1081 = vmatmul.f32.gmra.mxu0 %v998_v63  ;;  %1146 = vmatmul.f32.gmra.mxu1 %v999_v3  ;;  %v463_v63 = vadd.s32 64, %v2521_v16 }
  0xca   : > { %v862_v9 = vpop.permute.xlu1 %861 }
  0xcb   : > { %vm904_vm6 = vcmp.eq.s32.totalorder %v2334_v27, %v862_v9  ;;  %vm905_vm7 = vcmp.eq.s32.totalorder %v2343_v31, %v862_v9  ;;  %1919 = vset.pattern.permute.xlu2 %v2063_v2  ;;  %v868_v40 = vpop.permute.xlu2 %867  ;;  %v490_v9 = vpop.permute.xlu0 %489 }
  0xcc   : > { %1918 = vset.pattern.permute.xlu1 %v2064_v11  ;;  %v1778_v12 = vsel %vm904_vm6, 1.0, %v2065_v35  ;;  %v1779_v13 = vsel %vm905_vm7, 1.0, %v2065_v35  ;;  %312 = vperm.xlu2 %1919, %v2414_v57   ;;  %vm908_vm4 = vcmp.eq.s32.totalorder %v2334_v27, %v868_v40  ;;  %vm909_vm5 = vcmp.eq.s32.totalorder %v2343_v31, %v868_v40 }
  0xcd   : > { %885 = vperm.xlu1 %1918, %v844_v23   ;;  %v1000_v32 = vadd.f32 %v1778_v12, %v808_v49  ;;  %v1001_v14 = vadd.f32 %v1779_v13, %v809_v10  ;;  %v1782_v56 = vsel %vm908_vm4, 1.0, %v2065_v35  ;;  %v1783_v58 = vsel %vm909_vm5, 1.0, %v2065_v35 }
  0xd0   : > { %1084 = vmatmul.f32.gmra.mxu0 %v1000_v32  ;;  %1149 = vmatmul.f32.gmra.mxu1 %v1001_v14 }
  0xd3   : > { %v481_v22 = vpop.permute.xlu1 %480 }
  0xd4   : > { %vm522_vm14 = vcmp.eq.s32.totalorder %v2334_v27, %v481_v22  ;;  %vm523_vm15 = vcmp.eq.s32.totalorder %v2343_v31, %v481_v22  ;;  %1922 = vset.pattern.permute.xlu2 %v2064_v11  ;;  %v679_v29 = vpop.permute.xlu2 %678  ;;  %v1192_v22 = vld [vmem:[%s3027_s2 + $0x30] sm:$0xff] }
  0xd5   : > { %v1716_v57 = vsel %vm522_vm14, 1.0, %v2065_v35  ;;  %v1717_v26 = vsel %vm523_vm15, 1.0, %v2065_v35  ;;  %1921 = vset.pattern.permute.xlu1 %v2061_v0  ;;  %888 = vperm.xlu2 %1922, %v845_v17   ;;  %vm718_vm12 = vcmp.eq.s32.totalorder %v2334_v27, %v679_v29  ;;  %vm719_vm13 = vcmp.eq.s32.totalorder %v2343_v31, %v679_v29 }
  0xd6   : > { %v618_v33 = vadd.f32 %v1716_v57, %v1684_v18  ;;  %v619_v34 = vadd.f32 %v1717_v26, %v1685_v25  ;;  %696 = vperm.xlu1 %1921, %v653_v20   ;;  %v1752_v21 = vsel %vm718_vm12, 1.0, %v2065_v35  ;;  %v1193_v20 = vld [vmem:[%s3027_s2 + $0x38] sm:$0xff]  ;;  %v1191_v57 = vld [vmem:[%s3027_s2 + $0x28] sm:$0xff] }
  0xd7   : > { %1255 = vmatpush.msra.mxu2 %v1193_v20 }
  0xd8   : > { %v810_v38 = vadd.f32 %v1748_v28, %v618_v33  ;;  %v811_v39 = vadd.f32 %v1749_v24, %v619_v34 }
  0xd9   : > { %1256 = vmatpush.msra.mxu2 %v1192_v22 }
  0xda   : > { %v1002_v41 = vadd.f32 %v1780_v36, %v810_v38  ;;  %v1003_v42 = vadd.f32 %v1781_v37, %v811_v39 }
  0xdb   : > { %1257 = vmatpush.msra.mxu2 %v1191_v57 }
  0xdc   : > { %v292_v44 = vpop.permute.xlu1 %291  ;;  %1087 = vmatmul.f32.gmra.mxu0 %v1002_v41  ;;  %1152 = vmatmul.f32.gmra.mxu1 %v1003_v42  ;;  %v1190_v41 = vld [vmem:[%s3027_s2 + $0x20] sm:$0xff]  ;;  %v1189_v42 = vld [vmem:[%s3027_s2 + $0x18] sm:$0xff] }
  0xdd   : > { %1924 = vset.pattern.permute.xlu2 %v2062_v1  ;;  %vm332_vm2 = vcmp.eq.s32.totalorder %v2334_v27, %v292_v44  ;;  %vm333_vm3 = vcmp.eq.s32.totalorder %v2343_v31, %v292_v44  ;;  %1258 = vmatpush.msra.mxu2 %v1190_v41 }
  0xde   : > { %1923 = vset.pattern.permute.xlu1 %v2063_v2  ;;  %507 = vperm.xlu2 %1924, %v462_v30   ;;  %v1686_v47 = vsel %vm332_vm2, 1.0, %v2065_v35  ;;  %v1687_v48 = vsel %vm333_vm3, 1.0, %v2065_v35  ;;  %vm528_vm2 = vcmp.eq.s32.totalorder %v2334_v27, %v490_v9  ;;  %vm529_vm3 = vcmp.eq.s32.totalorder %v2343_v31, %v490_v9  ;;  %v1188_v30 = vld [vmem:[%s3027_s2 + $0x10] sm:$0xff] }
  0xdf   : > { %315 = vperm.xlu1 %1923, %v2467_v43   ;;  %v620_v52 = vadd.f32 %v1718_v45, %v1686_v47  ;;  %v621_v53 = vadd.f32 %v1719_v46, %v1687_v48  ;;  %v1722_v17 = vsel %vm528_vm2, 1.0, %v2065_v35  ;;  %v1723_v19 = vsel %vm529_vm3, 1.0, %v2065_v35  ;;  %1259 = vmatpush.msra.mxu2 %v1189_v42  ;;  %v685_v45 = vpop.permute.xlu0 %684  ;;  %v1187_v46 = vld [vmem:[%s3027_s2 + $0x8] sm:$0xff] }
  0xe0   : > { %vm722_vm12 = vcmp.eq.s32.totalorder %v2334_v27, %v685_v45 }
  0xe1   : > { %1260 = vmatpush.msra.mxu2 %v1188_v30 }
  0xe3   : > { %1261 = vmatpush.msra.mxu2 %v1187_v46 }
  0xe5   : > { %v676_v51 = vpop.permute.xlu1 %675 }
  0xe6   : > { %vm716_vm6 = vcmp.eq.s32.totalorder %v2334_v27, %v676_v51  ;;  %vm717_vm7 = vcmp.eq.s32.totalorder %v2343_v31, %v676_v51  ;;  %1927 = vset.pattern.permute.xlu2 %v2063_v2  ;;  %v298_v2 = vpop.permute.xlu2 %297 }
  0xe7   : > { %v1750_v54 = vsel %vm716_vm6, 1.0, %v2065_v35  ;;  %v1751_v55 = vsel %vm717_vm7, 1.0, %v2065_v35  ;;  %1926 = vset.pattern.permute.xlu1 %v2064_v11  ;;  %318 = vperm.xlu2 %1927, %v2521_v16   ;;  %vm336_vm0 = vcmp.eq.s32.totalorder %v2334_v27, %v298_v2  ;;  %vm337_vm1 = vcmp.eq.s32.totalorder %v2343_v31, %v298_v2 }
  0xe8   : > { %891 = vperm.xlu1 %1926, %v846_v50   ;;  %v812_v43 = vadd.f32 %v1750_v54, %v620_v52  ;;  %v813_v59 = vadd.f32 %v1751_v55, %v621_v53  ;;  %v1690_v15 = vsel %vm336_vm0, 1.0, %v2065_v35  ;;  %v1691_v16 = vsel %vm337_vm1, 1.0, %v2065_v35  ;;  %v1186_v52 = vld [vmem:[%s3027_s2] sm:$0xff] }
  0xe9   : > { %v624_v26 = vadd.f32 %v1722_v17, %v1690_v15  ;;  %v625_v28 = vadd.f32 %v1723_v19, %v1691_v16  ;;  %1262 = vmatpush.msra.mxu2 %v1186_v52  ;;  %v1756_v55 = vsel %vm722_vm12, 1.0, %v2065_v35 }
  0xea   : > { %v1004_v60 = vadd.f32 %v1782_v56, %v812_v43  ;;  %v1005_v61 = vadd.f32 %v1783_v58, %v813_v59 }
  0xec   : > { %1090 = vmatmul.f32.gmra.mxu0 %v1004_v60  ;;  %1155 = vmatmul.f32.gmra.mxu1 %v1005_v61 }
  0xee   : > { %v487_v3 = vpop.permute.xlu1 %486  ;;  %v874_v8 = vpop.permute.xlu2 %873 }
  0xef   : > { %vm526_vm8 = vcmp.eq.s32.totalorder %v2334_v27, %v487_v3  ;;  %vm527_vm9 = vcmp.eq.s32.totalorder %v2343_v31, %v487_v3  ;;  %1929 = vset.pattern.permute.xlu2 %v2061_v0  ;;  %v1688_v0 = vsel %vm334_vm10, 1.0, %v2065_v35  ;;  %vm912_vm4 = vcmp.eq.s32.totalorder %v2334_v27, %v874_v8  ;;  %v880_v3 = vpop.permute.xlu0 %879 }
  0xf0   : > { %1928 = vset.pattern.permute.xlu1 %v2062_v1  ;;  %702 = vperm.xlu2 %1929, %v655_v62   ;;  %v1720_v11 = vsel %vm526_vm8, 1.0, %v2065_v35  ;;  %v1721_v4 = vsel %vm527_vm9, 1.0, %v2065_v35  ;;  %v1753_v1 = vsel %vm719_vm13, 1.0, %v2065_v35  ;;  %vm913_vm5 = vcmp.eq.s32.totalorder %v2343_v31, %v874_v8 }
  0xf1   : > { %510 = vperm.xlu1 %1928, %v463_v63   ;;  %v622_v6 = vadd.f32 %v1720_v11, %v1688_v0  ;;  %v623_v7 = vadd.f32 %v1721_v4, %v1689_v5  ;;  %v1786_v34 = vsel %vm912_vm4, 1.0, %v2065_v35  ;;  %v1787_v36 = vsel %vm913_vm5, 1.0, %v2065_v35 }
  0xf2   : > { %vm723_vm13 = vcmp.eq.s32.totalorder %v2343_v31, %v685_v45 }
  0xf3   : > { %v814_v49 = vadd.f32 %v1752_v21, %v622_v6  ;;  %v815_v10 = vadd.f32 %v1753_v1, %v623_v7  ;;  %v1757_v56 = vsel %vm723_vm13, 1.0, %v2065_v35 }
  0xf6   : > { %v493_v25 = vpop.permute.xlu2 %492 }
  0xf7   : > { %v871_v23 = vpop.permute.xlu1 %870  ;;  %vm530_vm8 = vcmp.eq.s32.totalorder %v2334_v27, %v493_v25  ;;  %vm531_vm9 = vcmp.eq.s32.totalorder %v2343_v31, %v493_v25  ;;  %v310_v42 = vpop.permute.xlu0 %309 }
  0xf8   : > { %vm910_vm14 = vcmp.eq.s32.totalorder %v2334_v27, %v871_v23  ;;  %vm911_vm15 = vcmp.eq.s32.totalorder %v2343_v31, %v871_v23  ;;  %v1724_v47 = vsel %vm530_vm8, 1.0, %v2065_v35  ;;  %v1725_v48 = vsel %vm531_vm9, 1.0, %v2065_v35 }
  0xf9   : > { %v1784_v12 = vsel %vm910_vm14, 1.0, %v2065_v35  ;;  %v1785_v13 = vsel %vm911_vm15, 1.0, %v2065_v35 }
  0xfa   : > { %v1006_v32 = vadd.f32 %v1784_v12, %v814_v49  ;;  %v1007_v14 = vadd.f32 %v1785_v13, %v815_v10 }
  0xfc   : > { %1093 = vmatmul.f32.gmra.mxu0 %v1006_v32  ;;  %1158 = vmatmul.f32.gmra.mxu1 %v1007_v14 }
  0xfe   : > { %v304_v44 = vpop.permute.xlu2 %303 }
  0xff   : > { %vm340_vm0 = vcmp.eq.s32.totalorder %v2334_v27, %v304_v44  ;;  %vm341_vm1 = vcmp.eq.s32.totalorder %v2343_v31, %v304_v44 }
 0x100   : > { %v682_v18 = vpop.permute.xlu1 %681  ;;  %v1694_v11 = vsel %vm340_vm0, 1.0, %v2065_v35  ;;  %v1695_v4 = vsel %vm341_vm1, 1.0, %v2065_v35  ;;  %vm344_vm1 = vcmp.eq.s32.totalorder %v2334_v27, %v310_v42 }
 0x101   : > { %vm720_vm6 = vcmp.eq.s32.totalorder %v2334_v27, %v682_v18  ;;  %vm721_vm7 = vcmp.eq.s32.totalorder %v2343_v31, %v682_v18 }
 0x102   : > { %v1754_v24 = vsel %vm720_vm6, 1.0, %v2065_v35  ;;  %v1755_v33 = vsel %vm721_vm7, 1.0, %v2065_v35  ;;  %vm916_vm6 = vcmp.eq.s32.totalorder %v2334_v27, %v880_v3  ;;  %vm917_vm7 = vcmp.eq.s32.totalorder %v2343_v31, %v880_v3 }
 0x103   : > { %v816_v37 = vadd.f32 %v1754_v24, %v624_v26  ;;  %v817_v38 = vadd.f32 %v1755_v33, %v625_v28  ;;  %v1790_v9 = vsel %vm916_vm6, 1.0, %v2065_v35  ;;  %v1791_v49 = vsel %vm917_vm7, 1.0, %v2065_v35 }
 0x105   : > { %v1008_v39 = vadd.f32 %v1786_v34, %v816_v37  ;;  %v1009_v40 = vadd.f32 %v1787_v36, %v817_v38 }
 0x106   : > { %v688_v43 = vpop.permute.xlu2 %687 }
 0x107   : > { %1096 = vmatmul.f32.gmra.mxu0 %v1008_v39  ;;  %1161 = vmatmul.f32.gmra.mxu1 %v1009_v40  ;;  %vm724_vm2 = vcmp.eq.s32.totalorder %v2334_v27, %v688_v43  ;;  %vm725_vm3 = vcmp.eq.s32.totalorder %v2343_v31, %v688_v43 }
 0x108   : > { %v1758_v21 = vsel %vm724_vm2, 1.0, %v2065_v35  ;;  %v1759_v1 = vsel %vm725_vm3, 1.0, %v2065_v35  ;;  %vm345_vm2 = vcmp.eq.s32.totalorder %v2343_v31, %v310_v42 }
 0x109   : > { %v301_v29 = vpop.permute.xlu1 %300 }
 0x10a   : > { %vm338_vm10 = vcmp.eq.s32.totalorder %v2334_v27, %v301_v29  ;;  %vm339_vm11 = vcmp.eq.s32.totalorder %v2343_v31, %v301_v29 }
 0x10b   : > { %v1692_v50 = vsel %vm338_vm10, 1.0, %v2065_v35  ;;  %v1693_v51 = vsel %vm339_vm11, 1.0, %v2065_v35 }
 0x10c   : > { %v626_v53 = vadd.f32 %v1724_v47, %v1692_v50  ;;  %v627_v54 = vadd.f32 %v1725_v48, %v1693_v51  ;;  %v1698_v50 = vsel %vm344_vm1, 1.0, %v2065_v35  ;;  %v1699_v51 = vsel %vm345_vm2, 1.0, %v2065_v35 }
 0x10e   : > { %v818_v59 = vadd.f32 %v1756_v55, %v626_v53  ;;  %v819_v60 = vadd.f32 %v1757_v56, %v627_v54  ;;  %v499_v5 = vpop.permute.xlu2 %498 }
 0x10f   : > { %vm534_vm8 = vcmp.eq.s32.totalorder %v2334_v27, %v499_v5  ;;  %vm535_vm9 = vcmp.eq.s32.totalorder %v2343_v31, %v499_v5 }
 0x110   : > { %v1728_v16 = vsel %vm534_vm8, 1.0, %v2065_v35  ;;  %v1729_v17 = vsel %vm535_vm9, 1.0, %v2065_v35 }
 0x112   : > { %v877_v58 = vpop.permute.xlu1 %876 }
 0x113   : > { %vm914_vm14 = vcmp.eq.s32.totalorder %v2334_v27, %v877_v58  ;;  %vm915_vm15 = vcmp.eq.s32.totalorder %v2343_v31, %v877_v58 }
 0x114   : > { %v1788_v61 = vsel %vm914_vm14, 1.0, %v2065_v35  ;;  %v1789_v2 = vsel %vm915_vm15, 1.0, %v2065_v35  ;;  %vm1198_vm14 = vcmask 523264  }
 0x115   : > { %v1010_v62 = vadd.f32 %v1788_v61, %v818_v59  ;;  %v1011_v63 = vadd.f32 %v1789_v2, %v819_v60  ;;  %v505_v60 = vpop.permute.xlu0 %504 }
 0x116   : > { %v883_v15 = vpop.permute.xlu2 %882  ;;  %vm538_vm9 = vcmp.eq.s32.totalorder %v2334_v27, %v505_v60 }
 0x117   : > { %1099 = vmatmul.f32.gmra.mxu0 %v1010_v62  ;;  %1164 = vmatmul.f32.gmra.mxu1 %v1011_v63  ;;  %vm918_vm12 = vcmp.eq.s32.totalorder %v2334_v27, %v883_v15  ;;  %vm919_vm13 = vcmp.eq.s32.totalorder %v2343_v31, %v883_v15 }
 0x118   : > { %v1792_v36 = vsel %vm918_vm12, 1.0, %v2065_v35  ;;  %v1793_v37 = vsel %vm919_vm13, 1.0, %v2065_v35  ;;  %vm539_vm12 = vcmp.eq.s32.totalorder %v2343_v31, %v505_v60 }
 0x11b   : > { %v496_v0 = vpop.permute.xlu1 %495 }
 0x11c   : > { %vm532_vm4 = vcmp.eq.s32.totalorder %v2334_v27, %v496_v0  ;;  %vm533_vm5 = vcmp.eq.s32.totalorder %v2343_v31, %v496_v0  ;;  %v1732_v0 = vsel %vm538_vm9, 1.0, %v2065_v35 }
 0x11d   : > { %v1726_v6 = vsel %vm532_vm4, 1.0, %v2065_v35  ;;  %v1727_v7 = vsel %vm533_vm5, 1.0, %v2065_v35 }
 0x11e   : > { %v628_v8 = vadd.f32 %v1726_v6, %v1694_v11  ;;  %v629_v23 = vadd.f32 %v1727_v7, %v1695_v4  ;;  %v694_v24 = vpop.permute.xlu2 %693 }
 0x11f   : > { %vm728_vm5 = vcmp.eq.s32.totalorder %v2334_v27, %v694_v24  ;;  %vm729_vm6 = vcmp.eq.s32.totalorder %v2343_v31, %v694_v24 }
 0x120   : > { %v820_v10 = vadd.f32 %v1758_v21, %v628_v8  ;;  %v821_v12 = vadd.f32 %v1759_v1, %v629_v23  ;;  %v1762_v56 = vsel %vm728_vm5, 1.0, %v2065_v35  ;;  %v1763_v58 = vsel %vm729_vm6, 1.0, %v2065_v35 }
 0x121   : > { %v1733_v1 = vsel %vm539_vm12, 1.0, %v2065_v35 }
 0x122   : > { %v1012_v13 = vadd.f32 %v1790_v9, %v820_v10  ;;  %v1013_v32 = vadd.f32 %v1791_v49, %v821_v12 }
 0x124   : > { %v307_v14 = vpop.permute.xlu1 %306  ;;  %1102 = vmatmul.f32.gmra.mxu0 %v1012_v13  ;;  %1167 = vmatmul.f32.gmra.mxu1 %v1013_v32 }
 0x125   : > { %vm342_vm10 = vcmp.eq.s32.totalorder %v2334_v27, %v307_v14  ;;  %vm343_vm11 = vcmp.eq.s32.totalorder %v2343_v31, %v307_v14 }
 0x126   : > { %v1696_v19 = vsel %vm342_vm10, 1.0, %v2065_v35  ;;  %v1697_v20 = vsel %vm343_vm11, 1.0, %v2065_v35  ;;  %v313_v46 = vpop.permute.xlu2 %312 }
 0x127   : > { %v630_v26 = vadd.f32 %v1728_v16, %v1696_v19  ;;  %v631_v28 = vadd.f32 %v1729_v17, %v1697_v20  ;;  %vm346_vm10 = vcmp.eq.s32.totalorder %v2334_v27, %v313_v46  ;;  %vm347_vm11 = vcmp.eq.s32.totalorder %v2343_v31, %v313_v46 }
 0x128   : > { %v1700_v7 = vsel %vm346_vm10, 1.0, %v2065_v35  ;;  %v1701_v21 = vsel %vm347_vm11, 1.0, %v2065_v35 }
 0x129   : > { %v634_v9 = vadd.f32 %v1732_v0, %v1700_v7  ;;  %v635_v49 = vadd.f32 %v1733_v1, %v1701_v21  ;;  %v1343_v0 = vld [vmem:[%s3029_s4 + $0x78] sm:$0xff]  ;;  %v1341_v7 = vld [vmem:[%s3029_s4 + $0x68] sm:$0xff]  ;;  %v1340_v1 = vld [vmem:[%s3029_s4 + $0x60] sm:$0xff] }
 0x12a   : > { %1348 = vmatpush.msra.mxu3 %v1343_v0 }
 0x12c   : > { %v1073_v22 = vpop.f32.mrf.mxu0  ;;  %v1138_v18 = vpop.f32.mrf.mxu1 }
 0x12d   : > { %v1139_v25 = vadd.f32 %v1138_v18, %v1073_v22  ;;  %v691_v57 = vpop.permute.xlu1 %690 }
 0x12e   : > { %vm726_vm15 = vcmp.eq.s32.totalorder %v2334_v27, %v691_v57  ;;  %vm727_vm0 = vcmp.eq.s32.totalorder %v2343_v31, %v691_v57  ;;  %v700_v57 = vpop.permute.xlu0 %699 }
 0x12f   : > { %v1760_v33 = vsel %vm726_vm15, 1.0, %v2065_v35  ;;  %v1761_v34 = vsel %vm727_vm0, 1.0, %v2065_v35  ;;  %1802 = vmatmul.msk.f32.vlgmr.msra.gmra.mxu2 %vm1198_vm14, %v1139_v25  ;;  %v889_v4 = vpop.permute.xlu2 %888  ;;  %vm732_vm6 = vcmp.eq.s32.totalorder %v2334_v27, %v700_v57 }
 0x130   : > { %v822_v38 = vadd.f32 %v1760_v33, %v630_v26  ;;  %v823_v39 = vadd.f32 %v1761_v34, %v631_v28  ;;  %vm922_vm13 = vcmp.eq.s32.totalorder %v2334_v27, %v889_v4  ;;  %vm923_vm15 = vcmp.eq.s32.totalorder %v2343_v31, %v889_v4 }
 0x131   : > { %v1796_v13 = vsel %vm922_vm13, 1.0, %v2065_v35  ;;  %v1797_v32 = vsel %vm923_vm15, 1.0, %v2065_v35 }
 0x132   : > { %v1014_v40 = vadd.f32 %v1792_v36, %v822_v38  ;;  %v1015_v41 = vadd.f32 %v1793_v37, %v823_v39  ;;  %v1766_v38 = vsel %vm732_vm6, 1.0, %v2065_v35 }
 0x134   : > { %v1076_v30 = vpop.f32.mrf.mxu0  ;;  %1105 = vmatmul.f32.gmra.mxu0 %v1014_v40  ;;  %v1141_v44 = vpop.f32.mrf.mxu1  ;;  %1170 = vmatmul.f32.gmra.mxu1 %v1015_v41 }
 0x135   : > { %v1142_v29 = vadd.f32 %v1141_v44, %v1076_v30 }
 0x136   : > { %v502_v45 = vpop.permute.xlu1 %501 }
 0x137   : > { %vm536_vm3 = vcmp.eq.s32.totalorder %v2334_v27, %v502_v45  ;;  %vm537_vm4 = vcmp.eq.s32.totalorder %v2343_v31, %v502_v45  ;;  %1803 = vmatmul.msk.f32.gmra.mxu2 %vm1198_vm14, %v1142_v29 }
 0x138   : > { %v1730_v47 = vsel %vm536_vm3, 1.0, %v2065_v35  ;;  %v1731_v48 = vsel %vm537_vm4, 1.0, %v2065_v35  ;;  %v508_v16 = vpop.permute.xlu2 %507 }
 0x139   : > { %v632_v52 = vadd.f32 %v1730_v47, %v1698_v50  ;;  %v633_v53 = vadd.f32 %v1731_v48, %v1699_v51  ;;  %vm540_vm2 = vcmp.eq.s32.totalorder %v2334_v27, %v508_v16  ;;  %vm541_vm3 = vcmp.eq.s32.totalorder %v2343_v31, %v508_v16  ;;  %v895_v51 = vpop.permute.xlu0 %894  ;;  %v1332_v16 = vld [vmem:[%s3029_s4 + $0x20] sm:$0xff] }
 0x13a   : > { %v1734_v26 = vsel %vm540_vm2, 1.0, %v2065_v35  ;;  %v1735_v28 = vsel %vm541_vm3, 1.0, %v2065_v35  ;;  %vm927_vm2 = vcmp.eq.s32.totalorder %v2343_v31, %v895_v51 }
 0x13b   : > { %v824_v61 = vadd.f32 %v1762_v56, %v632_v52  ;;  %v825_v2 = vadd.f32 %v1763_v58, %v633_v53 }
 0x13c   : > { %v1079_v54 = vpop.f32.mrf.mxu0  ;;  %v1144_v55 = vpop.f32.mrf.mxu1 }
 0x13d   : > { %v1145_v43 = vadd.f32 %v1144_v55, %v1079_v54 }
 0x13f   : > { %v886_v59 = vpop.permute.xlu1 %885  ;;  %1804 = vmatmul.msk.f32.gmra.mxu2 %vm1198_vm14, %v1145_v43 }
 0x140   : > { %vm920_vm7 = vcmp.eq.s32.totalorder %v2334_v27, %v886_v59  ;;  %vm921_vm8 = vcmp.eq.s32.totalorder %v2343_v31, %v886_v59 }
 0x141   : > { %v1794_v62 = vsel %vm920_vm7, 1.0, %v2065_v35  ;;  %v1795_v63 = vsel %vm921_vm8, 1.0, %v2065_v35  ;;  %vm733_vm7 = vcmp.eq.s32.totalorder %v2343_v31, %v700_v57  ;;  %v319_v34 = vpop.permute.xlu2 %318  ;;  %v1328_v57 = vld [vmem:[%s3029_s4] sm:$0xff] }
 0x142   : > { %v1016_v3 = vadd.f32 %v1794_v62, %v824_v61  ;;  %v1017_v11 = vadd.f32 %v1795_v63, %v825_v2  ;;  %v1767_v39 = vsel %vm733_vm7, 1.0, %v2065_v35  ;;  %vm350_vm10 = vcmp.eq.s32.totalorder %v2334_v27, %v319_v34 }
 0x143   : > { %vm351_vm11 = vcmp.eq.s32.totalorder %v2343_v31, %v319_v34  ;;  %v1704_v52 = vsel %vm350_vm10, 1.0, %v2065_v35  ;;  %v1801_v2 = vsel %vm927_vm2, 1.0, %v2065_v35 }
 0x144   : > { %1108 = vmatmul.f32.gmra.mxu0 %v1016_v3  ;;  %1173 = vmatmul.f32.gmra.mxu1 %v1017_v11  ;;  %v1705_v53 = vsel %vm351_vm11, 1.0, %v2065_v35 }
 0x145   : > { %v1082_v5 = vpop.f32.mrf.mxu0  ;;  %v1147_v6 = vpop.f32.mrf.mxu1 }
 0x146   : > { %v1148_v8 = vadd.f32 %v1147_v6, %v1082_v5  ;;  %v1342_v5 = vld [vmem:[%s3029_s4 + $0x70] sm:$0xff] }
 0x147   : > { %1349 = vmatpush.msra.mxu3 %v1342_v5 }
 0x148   : > { %v697_v23 = vpop.permute.xlu1 %696  ;;  %1805 = vmatmul.msk.f32.gmra.mxu2 %vm1198_vm14, %v1148_v8  ;;  %v1339_v8 = vld [vmem:[%s3029_s4 + $0x58] sm:$0xff] }
 0x149   : > { %vm730_vm0 = vcmp.eq.s32.totalorder %v2334_v27, %v697_v23  ;;  %vm731_vm1 = vcmp.eq.s32.totalorder %v2343_v31, %v697_v23  ;;  %1350 = vmatpush.msra.mxu3 %v1341_v7  ;;  %v1338_v23 = vld [vmem:[%s3029_s4 + $0x50] sm:$0xff] }
 0x14a   : > { %v1764_v10 = vsel %vm730_vm0, 1.0, %v2065_v35  ;;  %v1765_v12 = vsel %vm731_vm1, 1.0, %v2065_v35  ;;  %v703_v50 = vpop.permute.xlu2 %702  ;;  %vm926_vm1 = vcmp.eq.s32.totalorder %v2334_v27, %v895_v51 }
 0x14b   : > { %v826_v14 = vadd.f32 %v1764_v10, %v634_v9  ;;  %v827_v15 = vadd.f32 %v1765_v12, %v635_v49  ;;  %vm734_vm12 = vcmp.eq.s32.totalorder %v2334_v27, %v703_v50  ;;  %vm735_vm13 = vcmp.eq.s32.totalorder %v2343_v31, %v703_v50  ;;  %1351 = vmatpush.msra.mxu3 %v1340_v1  ;;  %v1337_v10 = vld [vmem:[%s3029_s4 + $0x48] sm:$0xff]  ;;  %v1336_v12 = vld [vmem:[%s3029_s4 + $0x40] sm:$0xff] }
 0x14c   : > { %v1768_v58 = vsel %vm734_vm12, 1.0, %v2065_v35  ;;  %v1769_v43 = vsel %vm735_vm13, 1.0, %v2065_v35  ;;  %v1800_v61 = vsel %vm926_vm1, 1.0, %v2065_v35 }
 0x14d   : > { %v1085_v17 = vpop.f32.mrf.mxu0  ;;  %v1150_v19 = vpop.f32.mrf.mxu1  ;;  %v1018_v20 = vadd.f32 %v1796_v13, %v826_v14  ;;  %v1019_v22 = vadd.f32 %v1797_v32, %v827_v15  ;;  %1352 = vmatpush.msra.mxu3 %v1339_v8  ;;  %v1335_v32 = vld [vmem:[%s3029_s4 + $0x38] sm:$0xff]  ;;  %v1334_v14 = vld [vmem:[%s3029_s4 + $0x30] sm:$0xff]  ;;  %v1333_v15 = vld [vmem:[%s3029_s4 + $0x28] sm:$0xff] }
 0x14e   : > { %v1151_v18 = vadd.f32 %v1150_v19, %v1085_v17  ;;  %v1331_v17 = vld [vmem:[%s3029_s4 + $0x18] sm:$0xff]  ;;  %v1330_v19 = vld [vmem:[%s3029_s4 + $0x10] sm:$0xff] }
 0x14f   : > { %1111 = vmatmul.f32.gmra.mxu0 %v1018_v20  ;;  %1176 = vmatmul.f32.gmra.mxu1 %v1019_v22 }
 0x150   : > { %1806 = vmatmul.msk.f32.gmra.mxu2 %vm1198_vm14, %v1151_v18  ;;  %1353 = vmatpush.msra.mxu3 %v1338_v23  ;;  %v1329_v18 = vld [vmem:[%s3029_s4 + $0x8] sm:$0xff] }
 0x151   : > { %v316_v25 = vpop.permute.xlu1 %315 }
 0x152   : > { %vm348_vm4 = vcmp.eq.s32.totalorder %v2334_v27, %v316_v25  ;;  %vm349_vm5 = vcmp.eq.s32.totalorder %v2343_v31, %v316_v25  ;;  %1354 = vmatpush.msra.mxu3 %v1337_v10 }
 0x153   : > { %v1702_v24 = vsel %vm348_vm4, 1.0, %v2065_v35  ;;  %v1703_v33 = vsel %vm349_vm5, 1.0, %v2065_v35 }
 0x154   : > { %v636_v36 = vadd.f32 %v1734_v26, %v1702_v24  ;;  %v637_v37 = vadd.f32 %v1735_v28, %v1703_v33  ;;  %1355 = vmatpush.msra.mxu3 %v1336_v12  ;;  %v2814_v33 = vld [vmem:[%s3028_s3] ss:$0 sm:$0xff] }
 0x156   : > { %v828_v44 = vadd.f32 %v1766_v38, %v636_v36  ;;  %v829_v29 = vadd.f32 %v1767_v39, %v637_v37  ;;  %1356 = vmatpush.msra.mxu3 %v1335_v32  ;;  %v2835_v32 = vld [vmem:[%s3030_s5] ss:$0 sm:$0xff] }
 0x158   : > { %1357 = vmatpush.msra.mxu3 %v1334_v14 }
 0x159   : > { %v1088_v40 = vpop.f32.mrf.mxu0  ;;  %v1153_v41 = vpop.f32.mrf.mxu1 }
 0x15a   : > { %v1154_v42 = vadd.f32 %v1153_v41, %v1088_v40  ;;  %v892_v30 = vpop.permute.xlu1 %891  ;;  %1358 = vmatpush.msra.mxu3 %v1333_v15 }
 0x15b   : > { %vm924_vm8 = vcmp.eq.s32.totalorder %v2334_v27, %v892_v30  ;;  %vm925_vm9 = vcmp.eq.s32.totalorder %v2343_v31, %v892_v30 }
 0x15c   : > { %1807 = vmatmul.msk.f32.gmra.mxu2 %vm1198_vm14, %v1154_v42  ;;  %v1798_v45 = vsel %vm924_vm8, 1.0, %v2065_v35  ;;  %v1799_v46 = vsel %vm925_vm9, 1.0, %v2065_v35  ;;  %1359 = vmatpush.msra.mxu3 %v1332_v16 }
 0x15d   : > { %v1020_v47 = vadd.f32 %v1798_v45, %v828_v44  ;;  %v1021_v48 = vadd.f32 %v1799_v46, %v829_v29 }
 0x15e   : > { %1360 = vmatpush.msra.mxu3 %v1331_v17 }
 0x15f   : > { %1114 = vmatmul.f32.gmra.mxu0 %v1020_v47  ;;  %1179 = vmatmul.f32.gmra.mxu1 %v1021_v48 }
 0x160   : > { %1361 = vmatpush.msra.mxu3 %v1330_v19 }
 0x162   : > { %1362 = vmatpush.msra.mxu3 %v1329_v18 }
 0x163   : > { %v511_v54 = vpop.permute.xlu1 %510 }
 0x164   : > { %vm542_vm15 = vcmp.eq.s32.totalorder %v2334_v27, %v511_v54  ;;  %vm543_vm0 = vcmp.eq.s32.totalorder %v2343_v31, %v511_v54  ;;  %1363 = vmatpush.msra.mxu3 %v1328_v57 }
 0x165   : > { %v1736_v55 = vsel %vm542_vm15, 1.0, %v2065_v35  ;;  %v1737_v56 = vsel %vm543_vm0, 1.0, %v2065_v35 }
 0x166   : > { %v638_v59 = vadd.f32 %v1736_v55, %v1704_v52  ;;  %v639_v60 = vadd.f32 %v1737_v56, %v1705_v53 }
 0x168   : > { %v830_v62 = vadd.f32 %v1768_v58, %v638_v59  ;;  %v831_v63 = vadd.f32 %v1769_v43, %v639_v60 }
 0x169   : > { %v1091_v3 = vpop.f32.mrf.mxu0  ;;  %v1156_v27 = vpop.f32.mrf.mxu1 }
 0x16a   : > { %v1157_v11 = vadd.f32 %v1156_v27, %v1091_v3  ;;  %v1022_v31 = vadd.f32 %v1800_v61, %v830_v62  ;;  %v1023_v4 = vadd.f32 %v1801_v2, %v831_v63 }
 0x16c   : > { %1117 = vmatmul.f32.gmra.mxu0 %v1022_v31  ;;  %1182 = vmatmul.f32.gmra.mxu1 %v1023_v4 }
 0x16d   : > { %1808 = vmatmul.msk.f32.gmra.mxu2 %vm1198_vm14, %v1157_v11 }
 0x179   : > { %v1094_v35 = vpop.f32.mrf.mxu0  ;;  %v1159_v6 = vpop.f32.mrf.mxu1 }
 0x17a   : > { %v1160_v21 = vadd.f32 %v1159_v6, %v1094_v35 }
 0x17c   : > { %1809 = vmatmul.msk.f32.gmra.mxu2 %vm1198_vm14, %v1160_v21 }
 0x184   : > { %v1097_v9 = vpop.f32.mrf.mxu0  ;;  %v1162_v49 = vpop.f32.mrf.mxu1 }
 0x185   : > { %v1163_v13 = vadd.f32 %v1162_v49, %v1097_v9 }
 0x187   : > { %1810 = vmatmul.msk.f32.gmra.mxu2 %vm1198_vm14, %v1163_v13 }
 0x194   : > { %v1100_v20 = vpop.f32.mrf.mxu0  ;;  %v1165_v22 = vpop.f32.mrf.mxu1 }
 0x195   : > { %v1166_v25 = vadd.f32 %v1165_v22, %v1100_v20 }
 0x197   : > { %1811 = vmatmul.msk.f32.gmra.mxu2 %vm1198_vm14, %v1166_v25 }
 0x1a1   : > { %v1103_v26 = vpop.f32.mrf.mxu0  ;;  %v1168_v28 = vpop.f32.mrf.mxu1 }
 0x1a2   : > { %v1169_v24 = vadd.f32 %v1168_v28, %v1103_v26 }
 0x1a4   : > { %1812 = vmatmul.msk.f32.gmra.mxu2 %vm1198_vm14, %v1169_v24 }
 0x1b1   : > { %v1106_v34 = vpop.f32.mrf.mxu0  ;;  %v1171_v36 = vpop.f32.mrf.mxu1 }
 0x1b2   : > { %v1172_v37 = vadd.f32 %v1171_v36, %v1106_v34  ;;  %v1264_v38 = vpop.f32.mrf.mxu2 }
 0x1b3   : > { %v1265_v39 = vadd.f32 %v2814_v33, %v1264_v38 }
 0x1b4   : > { %1813 = vmatmul.msk.f32.gmra.mxu2 %vm1198_vm14, %v1172_v37 }
 0x1b5   : > { %v1312_v40 = vmax.f32 %v1265_v39, 0.0 }
 0x1b7   : > { %1364 = vmatmul.f32.vlgmr.msra.gmra.mxu3 %v1312_v40 }
 0x1ba   : > { %v1267_v41 = vpop.f32.mrf.mxu2 }
 0x1bb   : > { %v1268_v42 = vadd.f32 %v2814_v33, %v1267_v41 }
 0x1bd   : > { %v1313_v30 = vmax.f32 %v1268_v42, 0.0 }
 0x1bf   : > { %1367 = vmatmul.f32.gmra.mxu3 %v1313_v30 }
 0x1c1   : > { %v1109_v44 = vpop.f32.mrf.mxu0  ;;  %v1174_v29 = vpop.f32.mrf.mxu1 }
 0x1c2   : > { %v1175_v45 = vadd.f32 %v1174_v29, %v1109_v44  ;;  %v1270_v46 = vpop.f32.mrf.mxu2 }
 0x1c3   : > { %v1271_v47 = vadd.f32 %v2814_v33, %v1270_v46 }
 0x1c4   : > { %1814 = vmatmul.msk.f32.gmra.mxu2 %vm1198_vm14, %v1175_v45 }
 0x1c5   : > { %v1314_v48 = vmax.f32 %v1271_v47, 0.0 }
 0x1c7   : > { %1370 = vmatmul.f32.gmra.mxu3 %v1314_v48 }
 0x1cb   : > { %v1273_v50 = vpop.f32.mrf.mxu2 }
 0x1cc   : > { %v1274_v51 = vadd.f32 %v2814_v33, %v1273_v50  ;;  %v1112_v52 = vpop.f32.mrf.mxu0  ;;  %v1177_v53 = vpop.f32.mrf.mxu1 }
 0x1cd   : > { %v1178_v54 = vadd.f32 %v1177_v53, %v1112_v52 }
 0x1ce   : > { %v1315_v55 = vmax.f32 %v1274_v51, 0.0 }
 0x1cf   : > { %1815 = vmatmul.msk.f32.gmra.mxu2 %vm1198_vm14, %v1178_v54 }
 0x1d0   : > { %1373 = vmatmul.f32.gmra.mxu3 %v1315_v55 }
 0x1d3   : > { %v1276_v56 = vpop.f32.mrf.mxu2 }
 0x1d4   : > { %v1277_v58 = vadd.f32 %v2814_v33, %v1276_v56 }
 0x1d6   : > { %v1316_v43 = vmax.f32 %v1277_v58, 0.0 }
 0x1d8   : > { %1376 = vmatmul.f32.gmra.mxu3 %v1316_v43 }
 0x1dc   : > { %v1115_v59 = vpop.f32.mrf.mxu0  ;;  %v1180_v60 = vpop.f32.mrf.mxu1 }
 0x1dd   : > { %v1181_v61 = vadd.f32 %v1180_v60, %v1115_v59 }
 0x1df   : > { %v1279_v2 = vpop.f32.mrf.mxu2  ;;  %1816 = vmatmul.msk.f32.gmra.mxu2 %vm1198_vm14, %v1181_v61 }
 0x1e0   : > { %v1280_v62 = vadd.f32 %v2814_v33, %v1279_v2 }
 0x1e2   : > { %v1317_v63 = vmax.f32 %v1280_v62, 0.0 }
 0x1e4   : > { %1379 = vmatmul.f32.gmra.mxu3 %v1317_v63 }
 0x1e9   : > { %v1118_v3 = vpop.f32.mrf.mxu0  ;;  %v1183_v27 = vpop.f32.mrf.mxu1 }
 0x1ea   : > { %v1184_v11 = vadd.f32 %v1183_v27, %v1118_v3 }
 0x1ec   : > { %1817 = vmatmul.msk.f32.gmra.mxu2 %vm1198_vm14, %v1184_v11 }
 0x1f0   : > { %v1282_v31 = vpop.f32.mrf.mxu2 }
 0x1f1   : > { %v1283_v4 = vadd.f32 %v2814_v33, %v1282_v31 }
 0x1f3   : > { %v1318_v0 = vmax.f32 %v1283_v4, 0.0 }
 0x1f5   : > { %1382 = vmatmul.f32.gmra.mxu3 %v1318_v0 }
 0x1ff   : > { %v1285_v5 = vpop.f32.mrf.mxu2 }
 0x200   : > { %v1286_v35 = vadd.f32 %v2814_v33, %v1285_v5 }
 0x202   : > { %v1319_v6 = vmax.f32 %v1286_v35, 0.0 }
 0x204   : > { %1385 = vmatmul.f32.gmra.mxu3 %v1319_v6 }
 0x20a   : > { %v1288_v7 = vpop.f32.mrf.mxu2 }
 0x20b   : > { %v1289_v21 = vadd.f32 %v2814_v33, %v1288_v7 }
 0x20d   : > { %v1320_v1 = vmax.f32 %v1289_v21, 0.0 }
 0x20f   : > { %1388 = vmatmul.f32.gmra.mxu3 %v1320_v1 }
 0x21a   : > { %v1291_v8 = vpop.f32.mrf.mxu2 }
 0x21b   : > { %v1292_v23 = vadd.f32 %v2814_v33, %v1291_v8 }
 0x21d   : > { %v1321_v9 = vmax.f32 %v1292_v23, 0.0 }
 0x21f   : > { %1391 = vmatmul.f32.gmra.mxu3 %v1321_v9 }
 0x227   : > { %v1294_v49 = vpop.f32.mrf.mxu2 }
 0x228   : > { %v1295_v10 = vadd.f32 %v2814_v33, %v1294_v49 }
 0x22a   : > { %v1322_v12 = vmax.f32 %v1295_v10, 0.0 }
 0x22c   : > { %1394 = vmatmul.f32.gmra.mxu3 %v1322_v12 }
 0x237   : > { %v1297_v13 = vpop.f32.mrf.mxu2 }
 0x238   : > { %v1298_v14 = vadd.f32 %v2814_v33, %v1297_v13 }
 0x23a   : > { %v1323_v15 = vmax.f32 %v1298_v14, 0.0  ;;  %v1365_v16 = vpop.f32.mrf.mxu3 }
 0x23b   : > { %v1366_v17 = vadd.f32 %v2835_v32, %v1365_v16 }
 0x23c   : > { %1397 = vmatmul.f32.gmra.mxu3 %v1323_v15 }
 0x23d   : > { %1413 = vmax.xlane.f32.xlu1 %v1366_v17 }
 0x242   : > { %v1368_v19 = vpop.f32.mrf.mxu3 }
 0x243   : > { %v2840_v20 = vadd.f32 %v2835_v32, %v1368_v19 }
 0x245   : > { %1415 = vmax.xlane.f32.xlu2 %v2840_v20 }
 0x247   : > { %v1300_v22 = vpop.f32.mrf.mxu2 }
 0x248   : > { %v1301_v18 = vadd.f32 %v2814_v33, %v1300_v22 }
 0x24a   : > { %v1324_v25 = vmax.f32 %v1301_v18, 0.0  ;;  %v1371_v57 = vpop.f32.mrf.mxu3 }
 0x24b   : > { %v2845_v26 = vadd.f32 %v2835_v32, %v1371_v57 }
 0x24c   : > { %1400 = vmatmul.f32.gmra.mxu3 %v1324_v25 }
 0x24d   : > { %1417 = vmax.xlane.f32.xlu0 %v2845_v26 }
 0x252   : > { %v1303_v28 = vpop.f32.mrf.mxu2 }
 0x253   : > { %v1304_v24 = vadd.f32 %v2814_v33, %v1303_v28  ;;  %v1374_v34 = vpop.f32.mrf.mxu3 }
 0x254   : > { %v1375_v36 = vadd.f32 %v2835_v32, %v1374_v34 }
 0x255   : > { %v1325_v37 = vmax.f32 %v1304_v24, 0.0 }
 0x256   : > { %1419 = vmax.xlane.f32.xlu2 %v1375_v36 }
 0x257   : > { %1403 = vmatmul.f32.gmra.mxu3 %v1325_v37 }
 0x25b   : > { %v1377_v38 = vpop.f32.mrf.mxu3 }
 0x25c   : > { %v1378_v39 = vadd.f32 %v2835_v32, %v1377_v38 }
 0x25e   : > { %1421 = vmax.xlane.f32.xlu1 %v1378_v39 }
 0x262   : > { %v1306_v40 = vpop.f32.mrf.mxu2 }
 0x263   : > { %v1307_v41 = vadd.f32 %v2814_v33, %v1306_v40 }
 0x265   : > { %v1326_v42 = vmax.f32 %v1307_v41, 0.0 }
 0x267   : > { %v1380_v30 = vpop.f32.mrf.mxu3  ;;  %1406 = vmatmul.f32.gmra.mxu3 %v1326_v42 }
 0x268   : > { %v2853_v44 = vadd.f32 %v2835_v32, %v1380_v30 }
 0x26a   : > { %1423 = vmax.xlane.f32.xlu2 %v2853_v44 }
 0x26f   : > { %v1309_v29 = vpop.f32.mrf.mxu2 }
 0x270   : > { %v1310_v45 = vadd.f32 %v2814_v33, %v1309_v29 }
 0x272   : > { %v1327_v46 = vmax.f32 %v1310_v45, 0.0 }
 0x274   : > { %1409 = vmatmul.f32.gmra.mxu3 %v1327_v46 }
 0x278   : > { %v1383_v47 = vpop.f32.mrf.mxu3 }
 0x279   : > { %v1384_v48 = vadd.f32 %v2835_v32, %v1383_v47 }
 0x27b   : > { %1425 = vmax.xlane.f32.xlu1 %v1384_v48 }
 0x287   : > { %v1386_v50 = vpop.f32.mrf.mxu3 }
 0x288   : > { %v2859_v51 = vadd.f32 %v2835_v32, %v1386_v50 }
 0x28a   : > { %1427 = vmax.xlane.f32.xlu2 %v2859_v51 }
 0x292   : > { %v1389_v52 = vpop.f32.mrf.mxu3 }
 0x293   : > { %v2863_v53 = vadd.f32 %v2835_v32, %v1389_v52 }
 0x295   : > { %1429 = vmax.xlane.f32.xlu0 %v2863_v53 }
 0x2a2   : > { %v1392_v54 = vpop.f32.mrf.mxu3 }
 0x2a3   : > { %v2867_v33 = vadd.f32 %v2835_v32, %v1392_v54 }
 0x2a5   : > { %1431 = vmax.xlane.f32.xlu1 %v2867_v33 }
 0x2af   : > { %v1395_v55 = vpop.f32.mrf.mxu3 }
 0x2b0   : > { %v2871_v56 = vadd.f32 %v2835_v32, %v1395_v55  ;;  %v1414_v61 = vpop.xlane.xlu1 %1413 }
 0x2b1   : > { %v2882_v62 = vsub.f32 %v1366_v17, %v1414_v61 }
 0x2b2   : > { %1433 = vmax.xlane.f32.xlu2 %v2871_v56 }
 0x2b3   : > { %v1461_v63 = vmul.f32 1.442695, %v2882_v62 }
 0x2b5   : > { %1933 = vpow2.f32 %v1461_v63 }
 0x2b8   : > { %v1416_v2 = vpop.xlane.xlu2 %1415 }
 0x2b9   : > { %v2893_v5 = vsub.f32 %v2840_v20, %v1416_v2 }
 0x2bb   : > { %v1934_v0 = vpop.eup %1933  ;;  %v1463_v6 = vmul.f32 1.442695, %v2893_v5 }
 0x2bf   : > { %v1398_v58 = vpop.f32.mrf.mxu3 }
 0x2c0   : > { %v2875_v43 = vadd.f32 %v2835_v32, %v1398_v58  ;;  %v1418_v49 = vpop.xlane.xlu0 %1417 }
 0x2c1   : > { %v2907_v13 = vsub.f32 %v2845_v26, %v1418_v49 }
 0x2c2   : > { %1435 = vmax.xlane.f32.xlu0 %v2875_v43 }
 0x2c3   : > { %v1465_v16 = vmul.f32 1.442695, %v2907_v13 }
 0x2c9   : > { %v1420_v27 = vpop.xlane.xlu2 %1419 }
 0x2ca   : > { %v2889_v31 = vsub.f32 %v1375_v36, %v1420_v27 }
 0x2cc   : > { %v1467_v4 = vmul.f32 1.442695, %v2889_v31 }
 0x2ce   : > { %1935 = vpow2.f32 %v1467_v4 }
 0x2cf   : > { %v1401_v59 = vpop.f32.mrf.mxu3  ;;  %1937 = vpow2.f32 %v1463_v6 }
 0x2d0   : > { %v2879_v60 = vadd.f32 %v2835_v32, %v1401_v59 }
 0x2d1   : > { %v1422_v35 = vpop.xlane.xlu1 %1421 }
 0x2d2   : > { %1437 = vmax.xlane.f32.xlu1 %v2879_v60  ;;  %v2900_v8 = vsub.f32 %v1378_v39, %v1422_v35 }
 0x2d4   : > { %v1936_v1 = vpop.eup %1935  ;;  %v1469_v12 = vmul.f32 1.442695, %v2900_v8 }
 0x2d5   : > { %v1938_v14 = vpop.eup %1937 }
 0x2da   : > { %v1404_v3 = vpop.f32.mrf.mxu3 }
 0x2db   : > { %v2886_v11 = vadd.f32 %v2835_v32, %v1404_v3 }
 0x2dd   : > { %1439 = vmax.xlane.f32.xlu2 %v2886_v11  ;;  %v1424_v15 = vpop.xlane.xlu2 %1423 }
 0x2de   : > { %v2915_v22 = vsub.f32 %v2853_v44, %v1424_v15 }
 0x2e0   : > { %v1471_v26 = vmul.f32 1.442695, %v2915_v22 }
 0x2e5   : > { %1493 = vadd.xlane.f32.xlu2 %v1934_v0 }
 0x2ea   : > { %v1407_v7 = vpop.f32.mrf.mxu3 }
 0x2eb   : > { %v2897_v21 = vadd.f32 %v2835_v32, %v1407_v7 }
 0x2ed   : > { %1499 = vadd.xlane.f32.xlu2 %v1936_v1  ;;  %1441 = vmax.xlane.f32.xlu0 %v2897_v21 }
 0x2ee   : > { %v1426_v23 = vpop.xlane.xlu1 %1425 }
 0x2ef   : > { %v2902_v9 = vsub.f32 %v1384_v48, %v1426_v23 }
 0x2f1   : > { %v1473_v10 = vmul.f32 1.442695, %v2902_v9 }
 0x2f3   : > { %1939 = vpow2.f32 %v1473_v10 }
 0x2f4   : > { %1941 = vpow2.f32 %v1469_v12 }
 0x2f5   : > { %1495 = vadd.xlane.f32.xlu0 %v1938_v14  ;;  %1943 = vpow2.f32 %v1465_v16 }
 0x2f7   : > { %v1410_v17 = vpop.f32.mrf.mxu3 }
 0x2f8   : > { %v2911_v19 = vadd.f32 %v2835_v32, %v1410_v17 }
 0x2f9   : > { %v1940_v20 = vpop.eup %1939 }
 0x2fa   : > { %1505 = vadd.xlane.f32.xlu2 %v1940_v20  ;;  %1443 = vmax.xlane.f32.xlu1 %v2911_v19  ;;  %v1942_v18 = vpop.eup %1941 }
 0x2fb   : > { %v1944_v32 = vpop.eup %1943 }
 0x2fd   : > { %v1428_v25 = vpop.xlane.xlu2 %1427  ;;  %1501 = vadd.xlane.f32.xlu0 %v1942_v18 }
 0x2fe   : > { %v2918_v57 = vsub.f32 %v2859_v51, %v1428_v25 }
 0x300   : > { %v1475_v28 = vmul.f32 1.442695, %v2918_v57 }
 0x302   : > { %1945 = vpow2.f32 %v1475_v28  ;;  %1497 = vadd.xlane.f32.xlu1 %v1944_v32 }
 0x303   : > { %1947 = vpow2.f32 %v1471_v26 }
 0x308   : > { %v1946_v24 = vpop.eup %1945  ;;  %v1430_v34 = vpop.xlane.xlu0 %1429 }
 0x309   : > { %v1948_v36 = vpop.eup %1947  ;;  %v2923_v37 = vsub.f32 %v2863_v53, %v1430_v34  ;;  %1507 = vadd.xlane.f32.xlu0 %v1946_v24 }
 0x30a   : > { %1503 = vadd.xlane.f32.xlu1 %v1948_v36 }
 0x30b   : > { %v1477_v38 = vmul.f32 1.442695, %v2923_v37 }
 0x30d   : > { %1949 = vpow2.f32 %v1477_v38 }
 0x313   : > { %v1950_v39 = vpop.eup %1949 }
 0x314   : > { %1509 = vadd.xlane.f32.xlu1 %v1950_v39 }
 0x318   : > { %v1432_v40 = vpop.xlane.xlu1 %1431 }
 0x319   : > { %v2927_v41 = vsub.f32 %v2867_v33, %v1432_v40 }
 0x31b   : > { %v1479_v42 = vmul.f32 1.442695, %v2927_v41 }
 0x31d   : > { %1951 = vpow2.f32 %v1479_v42 }
 0x323   : > { %v1952_v30 = vpop.eup %1951 }
 0x324   : > { %1511 = vadd.xlane.f32.xlu2 %v1952_v30 }
 0x325   : > { %v1434_v44 = vpop.xlane.xlu2 %1433 }
 0x326   : > { %v2931_v29 = vsub.f32 %v2871_v56, %v1434_v44 }
 0x328   : > { %v1481_v45 = vmul.f32 1.442695, %v2931_v29 }
 0x32a   : > { %1953 = vpow2.f32 %v1481_v45 }
 0x330   : > { %v1954_v46 = vpop.eup %1953 }
 0x331   : > { %1513 = vadd.xlane.f32.xlu0 %v1954_v46 }
 0x335   : > { %v1436_v47 = vpop.xlane.xlu0 %1435 }
 0x336   : > { %v2935_v48 = vsub.f32 %v2875_v43, %v1436_v47 }
 0x338   : > { %v1483_v50 = vmul.f32 1.442695, %v2935_v48 }
 0x33a   : > { %1955 = vpow2.f32 %v1483_v50 }
 0x340   : > { %v1956_v51 = vpop.eup %1955 }
 0x341   : > { %1515 = vadd.xlane.f32.xlu1 %v1956_v51 }
 0x345   : > { %v1438_v52 = vpop.xlane.xlu1 %1437 }
 0x346   : > { %v2939_v53 = vsub.f32 %v2879_v60, %v1438_v52 }
 0x348   : > { %v1485_v54 = vmul.f32 1.442695, %v2939_v53 }
 0x34a   : > { %1957 = vpow2.f32 %v1485_v54 }
 0x350   : > { %v1958_v33 = vpop.eup %1957  ;;  %v1440_v55 = vpop.xlane.xlu2 %1439 }
 0x351   : > { %v2943_v56 = vsub.f32 %v2886_v11, %v1440_v55  ;;  %1517 = vadd.xlane.f32.xlu2 %v1958_v33 }
 0x353   : > { %v1487_v58 = vmul.f32 1.442695, %v2943_v56 }
 0x355   : > { %1959 = vpow2.f32 %v1487_v58 }
 0x358   : > { %v1494_v43 = vpop.xlane.xlu2 %1493 }
 0x359   : > { %1961 = vlog2.f32 %v1494_v43 }
 0x35b   : > { %v1960_v59 = vpop.eup %1959 }
 0x35c   : > { %1519 = vadd.xlane.f32.xlu0 %v1960_v59 }
 0x35f   : > { %v1962_v60 = vpop.eup %1961 }
 0x360   : > { %v1526_v61 = vmul.f32 0.6931472, %v1962_v60  ;;  %v1500_v2 = vpop.xlane.xlu2 %1499  ;;  %v1442_v63 = vpop.xlane.xlu0 %1441 }
 0x361   : > { %1963 = vlog2.f32 %v1500_v2  ;;  %v2950_v3 = vsub.f32 %v2897_v21, %v1442_v63 }
 0x362   : > { %v1557_v27 = vsub.f32 %v2882_v62, %v1526_v61 }
 0x363   : > { %v1489_v11 = vmul.f32 1.442695, %v2950_v3 }
 0x364   : > { %1573 = vst [vmem:[%s2954_s16] sm:$0xff] %v1557_v27 }
 0x365   : > { %1965 = vpow2.f32 %v1489_v11 }
 0x367   : > { %v1964_v4 = vpop.eup %1963 }
 0x368   : > { %v1532_v0 = vmul.f32 0.6931472, %v1964_v4  ;;  %v1496_v35 = vpop.xlane.xlu0 %1495 }
 0x369   : > { %1967 = vlog2.f32 %v1496_v35 }
 0x36a   : > { %v1560_v6 = vsub.f32 %v2889_v31, %v1532_v0 }
 0x36b   : > { %v1966_v7 = vpop.eup %1965 }
 0x36c   : > { %1576 = vst [vmem:[%s2954_s16 + $0x18] sm:$0xff] %v1560_v6  ;;  %1521 = vadd.xlane.f32.xlu1 %v1966_v7 }
 0x36d   : > { %v1506_v21 = vpop.xlane.xlu2 %1505  ;;  %v1444_v62 = vpop.xlane.xlu1 %1443 }
 0x36e   : > { %1969 = vlog2.f32 %v1506_v21  ;;  %v2960_v1 = vsub.f32 %v2911_v19, %v1444_v62 }
 0x36f   : > { %v1968_v23 = vpop.eup %1967 }
 0x370   : > { %v1528_v49 = vmul.f32 0.6931472, %v1968_v23  ;;  %v1491_v10 = vmul.f32 1.442695, %v2960_v1  ;;  %v1502_v12 = vpop.xlane.xlu0 %1501 }
 0x371   : > { %1971 = vlog2.f32 %v1502_v12 }
 0x372   : > { %v1558_v31 = vsub.f32 %v2893_v5, %v1528_v49  ;;  %1973 = vpow2.f32 %v1491_v10 }
 0x374   : > { %v1970_v14 = vpop.eup %1969  ;;  %1574 = vst [vmem:[%s2954_s16 + $0x8] sm:$0xff] %v1558_v31 }
 0x375   : > { %v1538_v15 = vmul.f32 0.6931472, %v1970_v14  ;;  %v1498_v16 = vpop.xlane.xlu1 %1497 }
 0x376   : > { %1975 = vlog2.f32 %v1498_v16 }
 0x377   : > { %v1972_v17 = vpop.eup %1971  ;;  %v1563_v19 = vsub.f32 %v2902_v9, %v1538_v15 }
 0x378   : > { %v1974_v20 = vpop.eup %1973  ;;  %v1534_v18 = vmul.f32 0.6931472, %v1972_v17 }
 0x379   : > { %1579 = vst [vmem:[%s2954_s16 + $0x30] sm:$0xff] %v1563_v19  ;;  %1523 = vadd.xlane.f32.xlu2 %v1974_v20 }
 0x37a   : > { %v1561_v25 = vsub.f32 %v2900_v8, %v1534_v18 }
 0x37c   : > { %v1976_v26 = vpop.eup %1975  ;;  %1577 = vst [vmem:[%s2954_s16 + $0x20] sm:$0xff] %v1561_v25  ;;  %v1508_v5 = vpop.xlane.xlu0 %1507 }
 0x37d   : > { %v1530_v28 = vmul.f32 0.6931472, %v1976_v26  ;;  %1977 = vlog2.f32 %v1508_v5  ;;  %v1504_v32 = vpop.xlane.xlu1 %1503 }
 0x37e   : > { %1979 = vlog2.f32 %v1504_v32 }
 0x37f   : > { %v1559_v24 = vsub.f32 %v2907_v13, %v1530_v28 }
 0x381   : > { %1575 = vst [vmem:[%s2954_s16 + $0x10] sm:$0xff] %v1559_v24 }
 0x383   : > { %v1978_v9 = vpop.eup %1977 }
 0x384   : > { %v1980_v34 = vpop.eup %1979  ;;  %v1540_v36 = vmul.f32 0.6931472, %v1978_v9 }
 0x385   : > { %v1536_v38 = vmul.f32 0.6931472, %v1980_v34 }
 0x386   : > { %v1564_v8 = vsub.f32 %v2918_v57, %v1540_v36 }
 0x387   : > { %v1562_v39 = vsub.f32 %v2915_v22, %v1536_v38  ;;  %v1510_v40 = vpop.xlane.xlu1 %1509 }
 0x388   : > { %1580 = vst [vmem:[%s2954_s16 + $0x38] sm:$0xff] %v1564_v8  ;;  %1981 = vlog2.f32 %v1510_v40 }
 0x389   : > { %1578 = vst [vmem:[%s2954_s16 + $0x28] sm:$0xff] %v1562_v39 }
 0x38e   : > { %v1982_v42 = vpop.eup %1981 }
 0x38f   : > { %v1542_v30 = vmul.f32 0.6931472, %v1982_v42 }
 0x391   : > { %v1565_v44 = vsub.f32 %v2923_v37, %v1542_v30 }
 0x393   : > { %1581 = vst [vmem:[%s2954_s16 + $0x40] sm:$0xff] %v1565_v44 }
 0x397   : > { %v1512_v13 = vpop.xlane.xlu2 %1511 }
 0x398   : > { %1983 = vlog2.f32 %v1512_v13 }
 0x39e   : > { %v1984_v45 = vpop.eup %1983 }
 0x39f   : > { %v1544_v46 = vmul.f32 0.6931472, %v1984_v45 }
 0x3a1   : > { %v1566_v47 = vsub.f32 %v2927_v41, %v1544_v46 }
 0x3a3   : > { %1582 = vst [vmem:[%s2954_s16 + $0x48] sm:$0xff] %v1566_v47 }
 0x3a4   : > { %v1514_v57 = vpop.xlane.xlu0 %1513 }
 0x3a5   : > { %1985 = vlog2.f32 %v1514_v57 }
 0x3ab   : > { %v1986_v22 = vpop.eup %1985 }
 0x3ac   : > { %v1546_v50 = vmul.f32 0.6931472, %v1986_v22 }
 0x3ae   : > { %v1567_v51 = vsub.f32 %v2931_v29, %v1546_v50 }
 0x3b0   : > { %1583 = vst [vmem:[%s2954_s16 + $0x50] sm:$0xff] %v1567_v51 }
 0x3b4   : > { %v1516_v52 = vpop.xlane.xlu1 %1515 }
 0x3b5   : > { %1987 = vlog2.f32 %v1516_v52 }
 0x3bb   : > { %v1988_v37 = vpop.eup %1987 }
 0x3bc   : > { %v1548_v54 = vmul.f32 0.6931472, %v1988_v37 }
 0x3be   : > { %v1568_v33 = vsub.f32 %v2935_v48, %v1548_v54 }
 0x3c0   : > { %1584 = vst [vmem:[%s2954_s16 + $0x58] sm:$0xff] %v1568_v33 }
 0x3c4   : > { %v1518_v55 = vpop.xlane.xlu2 %1517 }
 0x3c5   : > { %1989 = vlog2.f32 %v1518_v55 }
 0x3cb   : > { %v1990_v41 = vpop.eup %1989 }
 0x3cc   : > { %v1550_v58 = vmul.f32 0.6931472, %v1990_v41 }
 0x3ce   : > { %v1569_v43 = vsub.f32 %v2939_v53, %v1550_v58 }
 0x3cf   : > { %v1520_v59 = vpop.xlane.xlu0 %1519 }
 0x3d0   : > { %1585 = vst [vmem:[%s2954_s16 + $0x60] sm:$0xff] %v1569_v43  ;;  %1991 = vlog2.f32 %v1520_v59 }
 0x3d6   : > { %v1992_v29 = vpop.eup %1991 }
 0x3d7   : > { %v1552_v60 = vmul.f32 0.6931472, %v1992_v29 }
 0x3d9   : > { %v1570_v61 = vsub.f32 %v2943_v56, %v1552_v60 }
 0x3db   : > { %1586 = vst [vmem:[%s2954_s16 + $0x68] sm:$0xff] %v1570_v61 }
 0x3df   : > { %v1522_v2 = vpop.xlane.xlu1 %1521 }
 0x3e0   : > { %1993 = vlog2.f32 %v1522_v2 }
 0x3e6   : > { %v1994_v48 = vpop.eup %1993 }
 0x3e7   : > { %v1554_v63 = vmul.f32 0.6931472, %v1994_v48 }
 0x3e9   : > { %v1571_v27 = vsub.f32 %v2950_v3, %v1554_v63 }
 0x3eb   : > { %1587 = vst [vmem:[%s2954_s16 + $0x70] sm:$0xff] %v1571_v27 }
 0x3ec   : > { %v1524_v11 = vpop.xlane.xlu2 %1523 }
 0x3ed   : > { %1995 = vlog2.f32 %v1524_v11 }
 0x3f3   : > { %v1996_v53 = vpop.eup %1995 }
 0x3f4   : > { %v1556_v56 = vmul.f32 0.6931472, %v1996_v53 }
 0x3f6   : > { %v1572_v4 = vsub.f32 %v2960_v1, %v1556_v56 }
 0x3f8   : > { %1588 = vst [vmem:[%s2954_s16 + $0x78] sm:$0xff] %v1572_v4 }
 0x3f9   : > { %2024 = shalt.err (!%p2021_p3)
}
 0x3fa   : > { %s2066_s14 = smov 128   ;;  %s2067_s16 = smov 8  }
 0x3fb   : > { %1824 = dma.vmem_to_hbm [thread:$0]  (%p2141_p5), %s1603_s26, 2048, %s1605_s13, %s1590_s28, %s2066_s14, %s2066_s14, %s2067_s16  }
 0x3fc PF: > { %p1830_p4 = scmp.ge.s32.totalorder %s2059_s24, 2  ;;  %s1619_s17 = sand.u32 1, %s2047_s21  }
 0x3fd   : > { %s1620_s18 = scalar_lea.sflag [#allocation3], %s1619_s17 }
 0x3fe   : > { %p1827_p7 = pnand %p1830_p4, %p2145_p6 }
 0x400   : > { %p1828_p8 = pneg %p1827_p7 }
 0x402   : > { %2042 = dma.done.wait (%p1828_p8), %s1620_s18, 2048  }
 0x403   : > { %2044 = vsyncadd (%p1828_p8), %s1620_s18, 4294965248  ;;  %p16_p9 = scmp.ge.s32.totalorder %s2128_s27, 4   ;;  %s3034_s21 = smov %s2051_s22 }
 0x404   : > { %s3035_s22 = smov %s2055_s23  ;;  %s3036_s23 = smov %s2139_s30 }
 0x405   : > { %s3037_s24 = smov %s2128_s27  ;;  %18 = sbr.rel (!%p16_p9) target bundleno = 3 (0x3), region = 79 }
 0x40a   :  { %1626 = vsyncpa [#allocation3], 1 }
 0x40b   :  { %1628 = vsyncpa [#allocation3 + $0x1], 1 }

</bundles_post_ra>
